<compile_context>
chip_gen: v7x
topology: tpu7x:2x2x1
jax: 0.10.0
libtpu: 0.0.40
codegen_flags: <defaults>
</compile_context>

<pallas_src>
import jax
import jax.numpy as jnp
import numpy as np
from jax.experimental import pallas as pl
from jax.experimental.pallas import tpu as pltpu


# ----------------------------------------------------------------------------- kernel

def episodic_memory_kernel(
    facts_ref, q_ref, m_ref,
    z1_w_ref, z1_b_ref, z2_w_ref,
    agru_fw_ref, agru_fb_ref, agru_uw_ref, agru_ub_ref,
    nm_w_ref, nm_b_ref,
    out_ref,
    z_ref, fw_ref, gb_ref,
):
    BB, S, H = facts_ref.shape
    HP = fw_ref.shape[-1] // 2                 # lane-padded half width (>= H, mult of 128 if H < 128)
    dot_dtype = z_ref.dtype
    exact = dot_dtype == jnp.float32

    facts = facts_ref[...]                     # (BB, S, H) f32
    q = q_ref[...]                             # (BB, 1, H)
    m = m_ref[...]                             # (BB, 1, H)

    # ---- make_interaction: G = softmax(z2(tanh(z1(z)))) over sentences -------
    # The four interaction terms are written straight into the z scratch (the
    # fused K=4H z1 LHS) at lane offsets 0/H/2H/3H: no concatenate copy pass.
    z_ref[:, 0 * H:1 * H] = (facts * q).reshape(BB * S, H).astype(dot_dtype)
    z_ref[:, 1 * H:2 * H] = (facts * m).reshape(BB * S, H).astype(dot_dtype)
    z_ref[:, 2 * H:3 * H] = jnp.abs(facts - q).reshape(BB * S, H).astype(dot_dtype)
    z_ref[:, 3 * H:4 * H] = jnp.abs(facts - m).reshape(BB * S, H).astype(dot_dtype)

    # ONE K=4H matmul on the MXU (bf16 operands, f32 accumulation by default).
    pre = jnp.dot(z_ref[...], z1_w_ref[...],
                  preferred_element_type=jnp.float32) + z1_b_ref[...]      # (BB*S, H)
    t = jnp.tanh(pre).reshape(BB, S, H)

    # z2 is a (1, H) linear -> lane reduction (XLU slot).  z2 bias dropped:
    # softmax is shift-invariant so a uniform logit offset cannot change G.
    logits = jnp.sum(t * z2_w_ref[...], axis=-1)                           # (BB, S)
    logits = logits - jnp.max(logits, axis=-1, keepdims=True)
    e = jnp.exp(logits)
    denom = jnp.sum(e, axis=-1, keepdims=True)
    if exact:
        G = e / denom
    else:
        G = e * pl.reciprocal(denom, approx=True)                          # EUP slot

    # ---- AttentionGRU: hoist the fact-dependent matmuls -----------------------
    # One (BB*S,H)@(H,2*HP) dot gives [Wr(f)+wr_b+ur_b | W(f)+w_b] for every
    # step; each half is zero-padded to a 128-lane boundary so the per-step
    # slices below are vreg-aligned (no intra-vreg lane splits for H < 128).
    fw = jnp.dot(facts.reshape(BB * S, H).astype(dot_dtype), agru_fw_ref[...],
                 preferred_element_type=jnp.float32) + agru_fb_ref[...]    # (BB*S, 2*HP)
    fw = fw.reshape(BB, S, 2 * HP)

    # Stage per-step operands in VMEM scratch (sentence-major) so the serial
    # recurrence reads ref[sid] (leading-dim dynamic index) and live ranges
    # stay bounded even at large batch blocks.
    for sid in range(S):
        fw_ref[sid] = fw[:, sid, :]
        gb_ref[sid] = jnp.broadcast_to(G[:, sid:sid + 1], (BB, H))

    u_cat = agru_uw_ref[...]                   # (H, 2*HP), loop-invariant [Ur^T | U^T]
    u_b = agru_ub_ref[...]                     # (1, H)
    # NOTE: u_cat could be held weight-stationary on the MXU
    # (pltpu.matmul_push_rhs / matmul_acc_lhs / matmul_pop) to shave the
    # per-step RHS load off the serial critical path; kept as jnp.dot here for
    # portability across v5e/v6e/v7x result-path differences.

    def step(sid, C):
        # exactly ONE small serial MXU dot per step
        cu = jnp.dot(C.astype(dot_dtype), u_cat,
                     preferred_element_type=jnp.float32)                   # (BB, 2*HP)
        fwi = fw_ref[sid]                                                  # (BB, 2*HP)
        r = jax.nn.sigmoid(fwi[:, :H] + cu[:, :H])
        h_tilda = jnp.tanh(fwi[:, HP:HP + H] + r * (cu[:, HP:HP + H] + u_b))
        g = gb_ref[sid]                                                    # (BB, H)
        return C + g * (h_tilda - C)           # == g*h + (1-g)*C, one fewer VPU op

    C = jax.lax.fori_loop(0, S, step, jnp.zeros((BB, H), jnp.float32),
                          unroll=S <= 16)

    # ---- next_mem = relu(W [prevM; C; q] + b): one fused K=3H dot -------------
    concat = jnp.concatenate([m[:, 0, :], C, q[:, 0, :]], axis=-1)         # (BB, 3H)
    nm = jnp.dot(concat.astype(dot_dtype), nm_w_ref[...],
                 preferred_element_type=jnp.float32) + nm_b_ref[...]
    out_ref[...] = jnp.maximum(nm, 0.0)[:, None, :]


# ----------------------------------------------------------------------------- helpers

def _round_up(x, m):
    return ((x + m - 1) // m) * m


def _physical_vmem_bytes():
    """Per-TensorCore physical VMEM, by device generation (conservative default)."""
    try:
        kind = jax.devices()[0].device_kind.lower()
    except Exception:
        kind = ""
    if "v2" in kind or "v3" in kind:
        return 16 << 20
    if any(t in kind for t in ("v4", "v5", "v6")):
        return 128 << 20
    return 64 << 20            # v7x (and unknown future chips): be conservative


def _pick_batch_block(B, S, H, HP, dot_dtype, vmem_budget_bytes):
    """Largest batch block that (a) fits the VMEM budget, (b) gives >=~1024 MXU
    rows per grid step, (c) leaves >=2 grid steps so v7x megacore sharding kicks in."""
    zb = jnp.dtype(dot_dtype).itemsize
    per_elem = (2 * S * H * 4          # facts (double-buffered input)
                + 8 * H * 4            # q / m / out (double-buffered, small)
                + S * 4 * H * zb       # z scratch
                + S * 2 * HP * 4       # [Wr|W] scratch (padded halves)
                + S * H * 4            # gate scratch
                + 8 * S * H * 4)       # headroom for live temporaries
    cap_vmem = max(1, vmem_budget_bytes // per_elem)
    target_rows = max(8, -(-1024 // S))          # ceil(1024 / S)
    bb = min(B, cap_vmem, target_rows)
    if B >= 2:
        bb = min(bb, -(-B // 2))                 # keep at least 2 grid steps
    return max(1, int(bb))


# ----------------------------------------------------------------------------- params

def init_params(key, hidden_size):
    H = hidden_size
    ks = jax.random.split(key, 14)

    def xavier(k, fan_out, fan_in):              # torch.nn.init.xavier_normal_
        std = (2.0 / (fan_in + fan_out)) ** 0.5
        return (std * jax.random.normal(k, (fan_out, fan_in))).astype(jnp.float32)

    def bias(k, n):
        return (0.01 * jax.random.normal(k, (1, n))).astype(jnp.float32)

    p = {}
    p['z1_w'] = xavier(ks[0], H, 4 * H)          # (H, 4H) (PyTorch out,in layout)
    p['z1_b'] = bias(ks[1], H)                   # (1, H)
    p['z2_w'] = xavier(ks[2], 1, H)              # (1, H)
    p['z2_b'] = bias(ks[3], 1)                   # (1, 1)  (only used by the reference)
    p['wr_w'] = xavier(ks[4], H, H); p['wr_b'] = bias(ks[5], H)
    p['ur_w'] = xavier(ks[6], H, H); p['ur_b'] = bias(ks[7], H)
    p['w_w']  = xavier(ks[8], H, H); p['w_b']  = bias(ks[9], H)
    p['u_w']  = xavier(ks[10], H, H); p['u_b'] = bias(ks[11], H)
    p['nm_w'] = xavier(ks[12], H, 3 * H)         # (H, 3H)
    p['nm_b'] = bias(ks[13], H)
    return p


# ----------------------------------------------------------------------------- wrapper

def episodic_memory_forward(facts, questions, prevM, params, *,
                            batch_block=None, mxu_dtype=jnp.bfloat16):
    B, S, H = facts.shape
    f32 = jnp.float32
    dot_dtype = jnp.dtype(mxu_dtype)
    HP = H if H % 128 == 0 else _round_up(H, 128)   # lane-padded half width

    facts = facts.astype(f32)
    q = questions.reshape(B, 1, H).astype(f32)
    m = prevM.reshape(B, 1, H).astype(f32)

    # ---- pre-fused / pre-transposed / lane-padded weights ((in, out) layout) --
    def pad_half(w):            # (H, H) -> (H, HP): zero-pad output columns
        return jnp.pad(w, ((0, 0), (0, HP - H)))

    def pad_bias(b):            # (1, H) -> (1, HP)
        return jnp.pad(b, ((0, 0), (0, HP - H)))

    z1_w = params['z1_w'].T.astype(dot_dtype)                                   # (4H, H)
    z1_b = params['z1_b'].astype(f32)
    z2_w = params['z2_w'].astype(f32)                                           # (1, H)
    # z2 bias dropped on purpose: softmax is shift-invariant.
    agru_fw = jnp.concatenate([pad_half(params['wr_w'].T),
                               pad_half(params['w_w'].T)], axis=1).astype(dot_dtype)   # (H, 2HP)
    agru_fb = jnp.concatenate([pad_bias(params['wr_b'] + params['ur_b']),
                               pad_bias(params['w_b'])], axis=1).astype(f32)           # (1, 2HP)
    agru_uw = jnp.concatenate([pad_half(params['ur_w'].T),
                               pad_half(params['u_w'].T)], axis=1).astype(dot_dtype)   # (H, 2HP)
    agru_ub = params['u_b'].astype(f32)                                          # (1, H)
    nm_w = params['nm_w'].T.astype(dot_dtype)                                    # (3H, H)
    nm_b = params['nm_b'].astype(f32)

    weights = (z1_w, z1_b, z2_w, agru_fw, agru_fb, agru_uw, agru_ub, nm_w, nm_b)
    weight_bytes = sum(2 * w.size * w.dtype.itemsize for w in weights)

    physical_vmem = _physical_vmem_bytes()
    if batch_block is None:
        batch_block = _pick_batch_block(
            B, S, H, HP, dot_dtype, int(physical_vmem * 0.45) - weight_bytes)
    bb = max(1, min(int(batch_block), B))

    # Pad the batch to a multiple of the block; zero rows are inert (softmax of
    # zero logits is uniform, GRU on zeros is finite) and sliced off below.
    Bp = _round_up(B, bb)
    if Bp != B:
        pad = Bp - B
        facts = jnp.pad(facts, ((0, pad), (0, 0), (0, 0)))
        q = jnp.pad(q, ((0, pad), (0, 0), (0, 0)))
        m = jnp.pad(m, ((0, pad), (0, 0), (0, 0)))
    grid = (Bp // bb,)

    bmap3 = lambda i: (i, 0, 0)
    # Weights/biases: full arrays resident in VMEM, same block for every grid step.
    weight_specs = [pl.BlockSpec(w.shape, lambda i: (0, 0)) for w in weights]

    out = pl.pallas_call(
        episodic_memory_kernel,
        out_shape=jax.ShapeDtypeStruct((Bp, 1, H), f32),
        grid=grid,
        in_specs=[
            pl.BlockSpec((bb, S, H), bmap3),      # facts (streamed per batch block)
            pl.BlockSpec((bb, 1, H), bmap3),      # questions
            pl.BlockSpec((bb, 1, H), bmap3),      # prevM
        ] + weight_specs,
        out_specs=pl.BlockSpec((bb, 1, H), bmap3),
        scratch_shapes=[
            pltpu.VMEM((bb * S, 4 * H), dot_dtype),   # z: fused z1 LHS
            pltpu.VMEM((S, bb, 2 * HP), f32),         # [Wr|W](fact)+bias, padded halves
            pltpu.VMEM((S, bb, H), f32),              # gates pre-broadcast to (bb, H)
        ],
        compiler_params=pltpu.CompilerParams(
            dimension_semantics=("parallel",),
            vmem_limit_bytes=int(physical_vmem * 0.75)),
    )(facts, q, m, *weights)

    return out[:B]                                    # (B, 1, H), matches unsqueeze(1)


# ----------------------------------------------------------------------------- reference

def reference_forward(facts, questions, prevM, p):
    # Pure-JAX mirror of the PyTorch module (for correctness check only).
    B, S, H = facts.shape
    q = jnp.broadcast_to(questions, (B, S, H))
    m = jnp.broadcast_to(prevM, (B, S, H))
    z = jnp.concatenate([facts * q, facts * m,
                         jnp.abs(facts - q), jnp.abs(facts - m)], axis=2)
    z = z.reshape(-1, 4 * H)
    g1 = jnp.tanh(z @ p['z1_w'].T + p['z1_b'][0])
    Gl = (g1 @ p['z2_w'].T + p['z2_b'][0]).reshape(B, S)
    G = jax.nn.softmax(Gl, axis=1)
    C = jnp.zeros((B, H), jnp.float32)
    for sid in range(S):
        fact = facts[:, sid, :]
        g = G[:, sid:sid + 1]
        r = jax.nn.sigmoid(fact @ p['wr_w'].T + p['wr_b'][0]
                           + C @ p['ur_w'].T + p['ur_b'][0])
        h_tilda = jnp.tanh(fact @ p['w_w'].T + p['w_b'][0]
                           + r * (C @ p['u_w'].T + p['u_b'][0]))
        C = g * h_tilda + (1.0 - g) * C
    concat = jnp.concatenate([prevM[:, 0], C, questions[:, 0]], axis=1)
    nm = jax.nn.relu(concat @ p['nm_w'].T + p['nm_b'][0])
    return nm[:, None, :]


# ----------------------------------------------------------------------------- demo

if __name__ == "__main__":
    B, S, H = 8, 8, 32
    key = jax.random.PRNGKey(0)
    k_f, k_q, k_m, k_p = jax.random.split(key, 4)
    facts = jax.random.normal(k_f, (B, S, H), jnp.float32)
    questions = jax.random.normal(k_q, (B, 1, H), jnp.float32)
    prevM = jax.random.normal(k_m, (B, 1, H), jnp.float32)
    params = init_params(k_p, H)

    ref = reference_forward(facts, questions, prevM, params)

    # Exact (f32-MXU) path: tight parity with the PyTorch math.
    out_f32 = episodic_memory_forward(facts, questions, prevM, params,
                                      mxu_dtype=jnp.float32)
    out_f32 = jax.block_until_ready(out_f32)
    np.testing.assert_allclose(np.asarray(out_f32), np.asarray(ref),
                               atol=5e-3, rtol=5e-3)

    # Performance path (default): bf16 MXU operands, f32 accumulation.
    out_bf16 = episodic_memory_forward(facts, questions, prevM, params)
    out_bf16 = jax.block_until_ready(out_bf16)
    np.testing.assert_allclose(np.asarray(out_bf16), np.asarray(ref),
                               atol=6e-2, rtol=6e-2)

    print("KERNEL_OK")
</pallas_src>

<mosaic_0001>
module attributes {stable_mosaic.version = 11 : i64} {
  func.func @episodic_memory_kernel(%arg0: i32, %arg1: memref<4x8x32xf32, #tpu.memory_space<vmem>>, %arg2: memref<4x1x32xf32, #tpu.memory_space<vmem>>, %arg3: memref<4x1x32xf32, #tpu.memory_space<vmem>>, %arg4: memref<128x32xf32, #tpu.memory_space<vmem>>, %arg5: memref<1x32xf32, #tpu.memory_space<vmem>>, %arg6: memref<1x32xf32, #tpu.memory_space<vmem>>, %arg7: memref<32x256xf32, #tpu.memory_space<vmem>>, %arg8: memref<1x256xf32, #tpu.memory_space<vmem>>, %arg9: memref<32x256xf32, #tpu.memory_space<vmem>>, %arg10: memref<1x32xf32, #tpu.memory_space<vmem>>, %arg11: memref<96x32xf32, #tpu.memory_space<vmem>>, %arg12: memref<1x32xf32, #tpu.memory_space<vmem>>, %arg13: memref<4x1x32xf32, #tpu.memory_space<vmem>>, %arg14: memref<32x128xf32, #tpu.memory_space<vmem>>, %arg15: memref<8x4x256xf32, #tpu.memory_space<vmem>>, %arg16: memref<8x4x32xf32, #tpu.memory_space<vmem>>) attributes {dimension_semantics = [#tpu.dimension_semantics<parallel>], iteration_bounds = array<i64: 2>, scalar_prefetch = 0 : i64, scratch_operands = 3 : i64, tpu.core_type = #tpu.core_type<tc>, window_params = [{transform_indices = @transform_0, window_bounds = array<i64: 4, 8, 32>}, {transform_indices = @transform_1, window_bounds = array<i64: 4, 1, 32>}, {transform_indices = @transform_2, window_bounds = array<i64: 4, 1, 32>}, {pipeline_mode = #tpu.pipeline_mode<synchronous>, transform_indices = @transform_3, window_bounds = array<i64: 128, 32>}, {pipeline_mode = #tpu.pipeline_mode<synchronous>, transform_indices = @transform_4, window_bounds = array<i64: 1, 32>}, {pipeline_mode = #tpu.pipeline_mode<synchronous>, transform_indices = @transform_5, window_bounds = array<i64: 1, 32>}, {pipeline_mode = #tpu.pipeline_mode<synchronous>, transform_indices = @transform_6, window_bounds = array<i64: 32, 256>}, {pipeline_mode = #tpu.pipeline_mode<synchronous>, transform_indices = @transform_7, window_bounds = array<i64: 1, 256>}, {pipeline_mode = #tpu.pipeline_mode<synchronous>, transform_indices = @transform_8, window_bounds = array<i64: 32, 256>}, {pipeline_mode = #tpu.pipeline_mode<synchronous>, transform_indices = @transform_9, window_bounds = array<i64: 1, 32>}, {pipeline_mode = #tpu.pipeline_mode<synchronous>, transform_indices = @transform_10, window_bounds = array<i64: 96, 32>}, {pipeline_mode = #tpu.pipeline_mode<synchronous>, transform_indices = @transform_11, window_bounds = array<i64: 1, 32>}, {transform_indices = @transform_12, window_bounds = array<i64: 4, 1, 32>}]} {
    %c0 = arith.constant 0 : index
    %c0_0 = arith.constant 0 : index
    %c0_1 = arith.constant 0 : index
    %0 = vector.load %arg1[%c0, %c0_0, %c0_1] : memref<4x8x32xf32, #tpu.memory_space<vmem>>, vector<4x8x32xf32>
    %c0_2 = arith.constant 0 : index
    %c0_3 = arith.constant 0 : index
    %c0_4 = arith.constant 0 : index
    %1 = vector.load %arg2[%c0_2, %c0_3, %c0_4] : memref<4x1x32xf32, #tpu.memory_space<vmem>>, vector<4x1x32xf32>
    %c0_5 = arith.constant 0 : index
    %c0_6 = arith.constant 0 : index
    %c0_7 = arith.constant 0 : index
    %2 = vector.load %arg3[%c0_5, %c0_6, %c0_7] : memref<4x1x32xf32, #tpu.memory_space<vmem>>, vector<4x1x32xf32>
    %3 = vector.broadcast %1 : vector<4x1x32xf32> to vector<4x8x32xf32>
    %4 = arith.mulf %0, %3 : vector<4x8x32xf32>
    %5 = vector.shape_cast %4 : vector<4x8x32xf32> to vector<32x32xf32>
    %c0_8 = arith.constant 0 : index
    %c0_9 = arith.constant 0 : index
    %6 = vector.load %arg14[%c0_8, %c0_9] : memref<32x128xf32, #tpu.memory_space<vmem>>, vector<32x32xf32>
    tpu.vector_store %arg14[%c0_8, %c0_9], %5 {strides = array<i32>} : memref<32x128xf32, #tpu.memory_space<vmem>>, vector<32x32xf32>,
    %7 = vector.broadcast %2 : vector<4x1x32xf32> to vector<4x8x32xf32>
    %8 = arith.mulf %0, %7 : vector<4x8x32xf32>
    %9 = vector.shape_cast %8 : vector<4x8x32xf32> to vector<32x32xf32>
    %c0_10 = arith.constant 0 : index
    %c32 = arith.constant 32 : index
    %10 = vector.load %arg14[%c0_10, %c32] : memref<32x128xf32, #tpu.memory_space<vmem>>, vector<32x32xf32>
    tpu.vector_store %arg14[%c0_10, %c32], %9 {strides = array<i32>} : memref<32x128xf32, #tpu.memory_space<vmem>>, vector<32x32xf32>,
    %11 = vector.broadcast %1 : vector<4x1x32xf32> to vector<4x8x32xf32>
    %12 = arith.subf %0, %11 : vector<4x8x32xf32>
    %13 = math.absf %12 : vector<4x8x32xf32>
    %14 = vector.shape_cast %13 : vector<4x8x32xf32> to vector<32x32xf32>
    %c0_11 = arith.constant 0 : index
    %c64 = arith.constant 64 : index
    %15 = vector.load %arg14[%c0_11, %c64] : memref<32x128xf32, #tpu.memory_space<vmem>>, vector<32x32xf32>
    tpu.vector_store %arg14[%c0_11, %c64], %14 {strides = array<i32>} : memref<32x128xf32, #tpu.memory_space<vmem>>, vector<32x32xf32>,
    %16 = vector.broadcast %2 : vector<4x1x32xf32> to vector<4x8x32xf32>
    %17 = arith.subf %0, %16 : vector<4x8x32xf32>
    %18 = math.absf %17 : vector<4x8x32xf32>
    %19 = vector.shape_cast %18 : vector<4x8x32xf32> to vector<32x32xf32>
    %c0_12 = arith.constant 0 : index
    %c96 = arith.constant 96 : index
    %20 = vector.load %arg14[%c0_12, %c96] : memref<32x128xf32, #tpu.memory_space<vmem>>, vector<32x32xf32>
    tpu.vector_store %arg14[%c0_12, %c96], %19 {strides = array<i32>} : memref<32x128xf32, #tpu.memory_space<vmem>>, vector<32x32xf32>,
    %c0_13 = arith.constant 0 : index
    %c0_14 = arith.constant 0 : index
    %21 = vector.load %arg14[%c0_13, %c0_14] : memref<32x128xf32, #tpu.memory_space<vmem>>, vector<32x128xf32>
    %c0_15 = arith.constant 0 : index
    %c0_16 = arith.constant 0 : index
    %22 = vector.load %arg4[%c0_15, %c0_16] : memref<128x32xf32, #tpu.memory_space<vmem>>, vector<128x32xf32>
    %cst = arith.constant dense<0.000000e+00> : vector<32x32xf32>
    %23 = tpu.matmul %21, %22, %cst {dimension_numbers = #tpu.dot_dimension_numbers<[1], [0], [0], [1], [0, 0, 1, 1], [], []>} : vector<32x128xf32>, vector<128x32xf32>, vector<32x32xf32> -> vector<32x32xf32>
    %c0_17 = arith.constant 0 : index
    %c0_18 = arith.constant 0 : index
    %24 = vector.load %arg5[%c0_17, %c0_18] : memref<1x32xf32, #tpu.memory_space<vmem>>, vector<1x32xf32>
    %25 = vector.broadcast %24 : vector<1x32xf32> to vector<32x32xf32>
    %26 = arith.addf %23, %25 : vector<32x32xf32>
    %27 = math.tanh %26 : vector<32x32xf32>
    %28 = vector.shape_cast %27 : vector<32x32xf32> to vector<4x8x32xf32>
    %c0_19 = arith.constant 0 : index
    %c0_20 = arith.constant 0 : index
    %29 = vector.load %arg6[%c0_19, %c0_20] : memref<1x32xf32, #tpu.memory_space<vmem>>, vector<1x32xf32>
    %30 = vector.shape_cast %29 : vector<1x32xf32> to vector<1x1x32xf32>
    %31 = vector.broadcast %30 : vector<1x1x32xf32> to vector<4x8x32xf32>
    %32 = arith.mulf %28, %31 : vector<4x8x32xf32>
    %cst_21 = arith.constant dense<0.000000e+00> : vector<4x8xf32>
    %33 = vector.multi_reduction <add>, %32, %cst_21 [2] : vector<4x8x32xf32> to vector<4x8xf32>
    %cst_22 = arith.constant dense<0xFF800000> : vector<4xf32>
    %34 = vector.multi_reduction <maximumf>, %33, %cst_22 [1] : vector<4x8xf32> to vector<4xf32>
    %35 = vector.shape_cast %34 : vector<4xf32> to vector<4x1xf32>
    %36 = vector.broadcast %35 : vector<4x1xf32> to vector<4x8xf32>
    %37 = arith.subf %33, %36 : vector<4x8xf32>
    %38 = math.exp %37 : vector<4x8xf32>
    %cst_23 = arith.constant dense<0.000000e+00> : vector<4xf32>
    %39 = vector.multi_reduction <add>, %38, %cst_23 [1] : vector<4x8xf32> to vector<4xf32>
    %40 = vector.shape_cast %39 : vector<4xf32> to vector<4x1xf32>
    %41 = vector.broadcast %40 : vector<4x1xf32> to vector<4x8xf32>
    %42 = arith.divf %38, %41 : vector<4x8xf32>
    %43 = vector.shape_cast %0 : vector<4x8x32xf32> to vector<32x32xf32>
    %c0_24 = arith.constant 0 : index
    %c0_25 = arith.constant 0 : index
    %44 = vector.load %arg7[%c0_24, %c0_25] : memref<32x256xf32, #tpu.memory_space<vmem>>, vector<32x256xf32>
    %cst_26 = arith.constant dense<0.000000e+00> : vector<32x256xf32>
    %45 = tpu.matmul %43, %44, %cst_26 {dimension_numbers = #tpu.dot_dimension_numbers<[1], [0], [0], [1], [0, 0, 1, 1], [], []>} : vector<32x32xf32>, vector<32x256xf32>, vector<32x256xf32> -> vector<32x256xf32>
    %c0_27 = arith.constant 0 : index
    %c0_28 = arith.constant 0 : index
    %46 = vector.load %arg8[%c0_27, %c0_28] : memref<1x256xf32, #tpu.memory_space<vmem>>, vector<1x256xf32>
    %47 = vector.broadcast %46 : vector<1x256xf32> to vector<32x256xf32>
    %48 = arith.addf %45, %47 : vector<32x256xf32>
    %49 = vector.shape_cast %48 : vector<32x256xf32> to vector<4x8x256xf32>
    %50 = vector.extract_strided_slice %49 {offsets = [0, 0, 0], sizes = [4, 1, 256], strides = [1, 1, 1]} : vector<4x8x256xf32> to vector<4x1x256xf32>
    %51 = vector.shape_cast %50 : vector<4x1x256xf32> to vector<4x256xf32>
    %c0_29 = arith.constant 0 : index
    %c0_30 = arith.constant 0 : index
    %c0_31 = arith.constant 0 : index
    %52 = vector.load %arg15[%c0_29, %c0_30, %c0_31] : memref<8x4x256xf32, #tpu.memory_space<vmem>>, vector<1x4x256xf32>
    %53 = vector.shape_cast %52 : vector<1x4x256xf32> to vector<4x256xf32>
    %54 = vector.shape_cast %51 : vector<4x256xf32> to vector<1x4x256xf32>
    tpu.vector_store %arg15[%c0_29, %c0_30, %c0_31], %54 {strides = array<i32>} : memref<8x4x256xf32, #tpu.memory_space<vmem>>, vector<1x4x256xf32>,
    %55 = vector.extract_strided_slice %42 {offsets = [0, 0], sizes = [4, 1], strides = [1, 1]} : vector<4x8xf32> to vector<4x1xf32>
    %56 = vector.shape_cast %55 : vector<4x1xf32> to vector<4x1xf32>
    %57 = vector.broadcast %56 : vector<4x1xf32> to vector<4x32xf32>
    %c0_32 = arith.constant 0 : index
    %c0_33 = arith.constant 0 : index
    %c0_34 = arith.constant 0 : index
    %58 = vector.load %arg16[%c0_32, %c0_33, %c0_34] : memref<8x4x32xf32, #tpu.memory_space<vmem>>, vector<1x4x32xf32>
    %59 = vector.shape_cast %58 : vector<1x4x32xf32> to vector<4x32xf32>
    %60 = vector.shape_cast %57 : vector<4x32xf32> to vector<1x4x32xf32>
    tpu.vector_store %arg16[%c0_32, %c0_33, %c0_34], %60 {strides = array<i32>} : memref<8x4x32xf32, #tpu.memory_space<vmem>>, vector<1x4x32xf32>,
    %61 = vector.extract_strided_slice %49 {offsets = [0, 1, 0], sizes = [4, 1, 256], strides = [1, 1, 1]} : vector<4x8x256xf32> to vector<4x1x256xf32>
    %62 = vector.shape_cast %61 : vector<4x1x256xf32> to vector<4x256xf32>
    %c1 = arith.constant 1 : index
    %c0_35 = arith.constant 0 : index
    %c0_36 = arith.constant 0 : index
    %63 = vector.load %arg15[%c1, %c0_35, %c0_36] : memref<8x4x256xf32, #tpu.memory_space<vmem>>, vector<1x4x256xf32>
    %64 = vector.shape_cast %63 : vector<1x4x256xf32> to vector<4x256xf32>
    %65 = vector.shape_cast %62 : vector<4x256xf32> to vector<1x4x256xf32>
    tpu.vector_store %arg15[%c1, %c0_35, %c0_36], %65 {strides = array<i32>} : memref<8x4x256xf32, #tpu.memory_space<vmem>>, vector<1x4x256xf32>,
    %66 = vector.extract_strided_slice %42 {offsets = [0, 1], sizes = [4, 1], strides = [1, 1]} : vector<4x8xf32> to vector<4x1xf32>
    %67 = vector.shape_cast %66 : vector<4x1xf32> to vector<4x1xf32>
    %68 = vector.broadcast %67 : vector<4x1xf32> to vector<4x32xf32>
    %c1_37 = arith.constant 1 : index
    %c0_38 = arith.constant 0 : index
    %c0_39 = arith.constant 0 : index
    %69 = vector.load %arg16[%c1_37, %c0_38, %c0_39] : memref<8x4x32xf32, #tpu.memory_space<vmem>>, vector<1x4x32xf32>
    %70 = vector.shape_cast %69 : vector<1x4x32xf32> to vector<4x32xf32>
    %71 = vector.shape_cast %68 : vector<4x32xf32> to vector<1x4x32xf32>
    tpu.vector_store %arg16[%c1_37, %c0_38, %c0_39], %71 {strides = array<i32>} : memref<8x4x32xf32, #tpu.memory_space<vmem>>, vector<1x4x32xf32>,
    %72 = vector.extract_strided_slice %49 {offsets = [0, 2, 0], sizes = [4, 1, 256], strides = [1, 1, 1]} : vector<4x8x256xf32> to vector<4x1x256xf32>
    %73 = vector.shape_cast %72 : vector<4x1x256xf32> to vector<4x256xf32>
    %c2 = arith.constant 2 : index
    %c0_40 = arith.constant 0 : index
    %c0_41 = arith.constant 0 : index
    %74 = vector.load %arg15[%c2, %c0_40, %c0_41] : memref<8x4x256xf32, #tpu.memory_space<vmem>>, vector<1x4x256xf32>
    %75 = vector.shape_cast %74 : vector<1x4x256xf32> to vector<4x256xf32>
    %76 = vector.shape_cast %73 : vector<4x256xf32> to vector<1x4x256xf32>
    tpu.vector_store %arg15[%c2, %c0_40, %c0_41], %76 {strides = array<i32>} : memref<8x4x256xf32, #tpu.memory_space<vmem>>, vector<1x4x256xf32>,
    %77 = vector.extract_strided_slice %42 {offsets = [0, 2], sizes = [4, 1], strides = [1, 1]} : vector<4x8xf32> to vector<4x1xf32>
    %78 = vector.shape_cast %77 : vector<4x1xf32> to vector<4x1xf32>
    %79 = vector.broadcast %78 : vector<4x1xf32> to vector<4x32xf32>
    %c2_42 = arith.constant 2 : index
    %c0_43 = arith.constant 0 : index
    %c0_44 = arith.constant 0 : index
    %80 = vector.load %arg16[%c2_42, %c0_43, %c0_44] : memref<8x4x32xf32, #tpu.memory_space<vmem>>, vector<1x4x32xf32>
    %81 = vector.shape_cast %80 : vector<1x4x32xf32> to vector<4x32xf32>
    %82 = vector.shape_cast %79 : vector<4x32xf32> to vector<1x4x32xf32>
    tpu.vector_store %arg16[%c2_42, %c0_43, %c0_44], %82 {strides = array<i32>} : memref<8x4x32xf32, #tpu.memory_space<vmem>>, vector<1x4x32xf32>,
    %83 = vector.extract_strided_slice %49 {offsets = [0, 3, 0], sizes = [4, 1, 256], strides = [1, 1, 1]} : vector<4x8x256xf32> to vector<4x1x256xf32>
    %84 = vector.shape_cast %83 : vector<4x1x256xf32> to vector<4x256xf32>
    %c3 = arith.constant 3 : index
    %c0_45 = arith.constant 0 : index
    %c0_46 = arith.constant 0 : index
    %85 = vector.load %arg15[%c3, %c0_45, %c0_46] : memref<8x4x256xf32, #tpu.memory_space<vmem>>, vector<1x4x256xf32>
    %86 = vector.shape_cast %85 : vector<1x4x256xf32> to vector<4x256xf32>
    %87 = vector.shape_cast %84 : vector<4x256xf32> to vector<1x4x256xf32>
    tpu.vector_store %arg15[%c3, %c0_45, %c0_46], %87 {strides = array<i32>} : memref<8x4x256xf32, #tpu.memory_space<vmem>>, vector<1x4x256xf32>,
    %88 = vector.extract_strided_slice %42 {offsets = [0, 3], sizes = [4, 1], strides = [1, 1]} : vector<4x8xf32> to vector<4x1xf32>
    %89 = vector.shape_cast %88 : vector<4x1xf32> to vector<4x1xf32>
    %90 = vector.broadcast %89 : vector<4x1xf32> to vector<4x32xf32>
    %c3_47 = arith.constant 3 : index
    %c0_48 = arith.constant 0 : index
    %c0_49 = arith.constant 0 : index
    %91 = vector.load %arg16[%c3_47, %c0_48, %c0_49] : memref<8x4x32xf32, #tpu.memory_space<vmem>>, vector<1x4x32xf32>
    %92 = vector.shape_cast %91 : vector<1x4x32xf32> to vector<4x32xf32>
    %93 = vector.shape_cast %90 : vector<4x32xf32> to vector<1x4x32xf32>
    tpu.vector_store %arg16[%c3_47, %c0_48, %c0_49], %93 {strides = array<i32>} : memref<8x4x32xf32, #tpu.memory_space<vmem>>, vector<1x4x32xf32>,
    %94 = vector.extract_strided_slice %49 {offsets = [0, 4, 0], sizes = [4, 1, 256], strides = [1, 1, 1]} : vector<4x8x256xf32> to vector<4x1x256xf32>
    %95 = vector.shape_cast %94 : vector<4x1x256xf32> to vector<4x256xf32>
    %c4 = arith.constant 4 : index
    %c0_50 = arith.constant 0 : index
    %c0_51 = arith.constant 0 : index
    %96 = vector.load %arg15[%c4, %c0_50, %c0_51] : memref<8x4x256xf32, #tpu.memory_space<vmem>>, vector<1x4x256xf32>
    %97 = vector.shape_cast %96 : vector<1x4x256xf32> to vector<4x256xf32>
    %98 = vector.shape_cast %95 : vector<4x256xf32> to vector<1x4x256xf32>
    tpu.vector_store %arg15[%c4, %c0_50, %c0_51], %98 {strides = array<i32>} : memref<8x4x256xf32, #tpu.memory_space<vmem>>, vector<1x4x256xf32>,
    %99 = vector.extract_strided_slice %42 {offsets = [0, 4], sizes = [4, 1], strides = [1, 1]} : vector<4x8xf32> to vector<4x1xf32>
    %100 = vector.shape_cast %99 : vector<4x1xf32> to vector<4x1xf32>
    %101 = vector.broadcast %100 : vector<4x1xf32> to vector<4x32xf32>
    %c4_52 = arith.constant 4 : index
    %c0_53 = arith.constant 0 : index
    %c0_54 = arith.constant 0 : index
    %102 = vector.load %arg16[%c4_52, %c0_53, %c0_54] : memref<8x4x32xf32, #tpu.memory_space<vmem>>, vector<1x4x32xf32>
    %103 = vector.shape_cast %102 : vector<1x4x32xf32> to vector<4x32xf32>
    %104 = vector.shape_cast %101 : vector<4x32xf32> to vector<1x4x32xf32>
    tpu.vector_store %arg16[%c4_52, %c0_53, %c0_54], %104 {strides = array<i32>} : memref<8x4x32xf32, #tpu.memory_space<vmem>>, vector<1x4x32xf32>,
    %105 = vector.extract_strided_slice %49 {offsets = [0, 5, 0], sizes = [4, 1, 256], strides = [1, 1, 1]} : vector<4x8x256xf32> to vector<4x1x256xf32>
    %106 = vector.shape_cast %105 : vector<4x1x256xf32> to vector<4x256xf32>
    %c5 = arith.constant 5 : index
    %c0_55 = arith.constant 0 : index
    %c0_56 = arith.constant 0 : index
    %107 = vector.load %arg15[%c5, %c0_55, %c0_56] : memref<8x4x256xf32, #tpu.memory_space<vmem>>, vector<1x4x256xf32>
    %108 = vector.shape_cast %107 : vector<1x4x256xf32> to vector<4x256xf32>
    %109 = vector.shape_cast %106 : vector<4x256xf32> to vector<1x4x256xf32>
    tpu.vector_store %arg15[%c5, %c0_55, %c0_56], %109 {strides = array<i32>} : memref<8x4x256xf32, #tpu.memory_space<vmem>>, vector<1x4x256xf32>,
    %110 = vector.extract_strided_slice %42 {offsets = [0, 5], sizes = [4, 1], strides = [1, 1]} : vector<4x8xf32> to vector<4x1xf32>
    %111 = vector.shape_cast %110 : vector<4x1xf32> to vector<4x1xf32>
    %112 = vector.broadcast %111 : vector<4x1xf32> to vector<4x32xf32>
    %c5_57 = arith.constant 5 : index
    %c0_58 = arith.constant 0 : index
    %c0_59 = arith.constant 0 : index
    %113 = vector.load %arg16[%c5_57, %c0_58, %c0_59] : memref<8x4x32xf32, #tpu.memory_space<vmem>>, vector<1x4x32xf32>
    %114 = vector.shape_cast %113 : vector<1x4x32xf32> to vector<4x32xf32>
    %115 = vector.shape_cast %112 : vector<4x32xf32> to vector<1x4x32xf32>
    tpu.vector_store %arg16[%c5_57, %c0_58, %c0_59], %115 {strides = array<i32>} : memref<8x4x32xf32, #tpu.memory_space<vmem>>, vector<1x4x32xf32>,
    %116 = vector.extract_strided_slice %49 {offsets = [0, 6, 0], sizes = [4, 1, 256], strides = [1, 1, 1]} : vector<4x8x256xf32> to vector<4x1x256xf32>
    %117 = vector.shape_cast %116 : vector<4x1x256xf32> to vector<4x256xf32>
    %c6 = arith.constant 6 : index
    %c0_60 = arith.constant 0 : index
    %c0_61 = arith.constant 0 : index
    %118 = vector.load %arg15[%c6, %c0_60, %c0_61] : memref<8x4x256xf32, #tpu.memory_space<vmem>>, vector<1x4x256xf32>
    %119 = vector.shape_cast %118 : vector<1x4x256xf32> to vector<4x256xf32>
    %120 = vector.shape_cast %117 : vector<4x256xf32> to vector<1x4x256xf32>
    tpu.vector_store %arg15[%c6, %c0_60, %c0_61], %120 {strides = array<i32>} : memref<8x4x256xf32, #tpu.memory_space<vmem>>, vector<1x4x256xf32>,
    %121 = vector.extract_strided_slice %42 {offsets = [0, 6], sizes = [4, 1], strides = [1, 1]} : vector<4x8xf32> to vector<4x1xf32>
    %122 = vector.shape_cast %121 : vector<4x1xf32> to vector<4x1xf32>
    %123 = vector.broadcast %122 : vector<4x1xf32> to vector<4x32xf32>
    %c6_62 = arith.constant 6 : index
    %c0_63 = arith.constant 0 : index
    %c0_64 = arith.constant 0 : index
    %124 = vector.load %arg16[%c6_62, %c0_63, %c0_64] : memref<8x4x32xf32, #tpu.memory_space<vmem>>, vector<1x4x32xf32>
    %125 = vector.shape_cast %124 : vector<1x4x32xf32> to vector<4x32xf32>
    %126 = vector.shape_cast %123 : vector<4x32xf32> to vector<1x4x32xf32>
    tpu.vector_store %arg16[%c6_62, %c0_63, %c0_64], %126 {strides = array<i32>} : memref<8x4x32xf32, #tpu.memory_space<vmem>>, vector<1x4x32xf32>,
    %127 = vector.extract_strided_slice %49 {offsets = [0, 7, 0], sizes = [4, 1, 256], strides = [1, 1, 1]} : vector<4x8x256xf32> to vector<4x1x256xf32>
    %128 = vector.shape_cast %127 : vector<4x1x256xf32> to vector<4x256xf32>
    %c7 = arith.constant 7 : index
    %c0_65 = arith.constant 0 : index
    %c0_66 = arith.constant 0 : index
    %129 = vector.load %arg15[%c7, %c0_65, %c0_66] : memref<8x4x256xf32, #tpu.memory_space<vmem>>, vector<1x4x256xf32>
    %130 = vector.shape_cast %129 : vector<1x4x256xf32> to vector<4x256xf32>
    %131 = vector.shape_cast %128 : vector<4x256xf32> to vector<1x4x256xf32>
    tpu.vector_store %arg15[%c7, %c0_65, %c0_66], %131 {strides = array<i32>} : memref<8x4x256xf32, #tpu.memory_space<vmem>>, vector<1x4x256xf32>,
    %132 = vector.extract_strided_slice %42 {offsets = [0, 7], sizes = [4, 1], strides = [1, 1]} : vector<4x8xf32> to vector<4x1xf32>
    %133 = vector.shape_cast %132 : vector<4x1xf32> to vector<4x1xf32>
    %134 = vector.broadcast %133 : vector<4x1xf32> to vector<4x32xf32>
    %c7_67 = arith.constant 7 : index
    %c0_68 = arith.constant 0 : index
    %c0_69 = arith.constant 0 : index
    %135 = vector.load %arg16[%c7_67, %c0_68, %c0_69] : memref<8x4x32xf32, #tpu.memory_space<vmem>>, vector<1x4x32xf32>
    %136 = vector.shape_cast %135 : vector<1x4x32xf32> to vector<4x32xf32>
    %137 = vector.shape_cast %134 : vector<4x32xf32> to vector<1x4x32xf32>
    tpu.vector_store %arg16[%c7_67, %c0_68, %c0_69], %137 {strides = array<i32>} : memref<8x4x32xf32, #tpu.memory_space<vmem>>, vector<1x4x32xf32>,
    %c0_70 = arith.constant 0 : index
    %c0_71 = arith.constant 0 : index
    %138 = vector.load %arg9[%c0_70, %c0_71] : memref<32x256xf32, #tpu.memory_space<vmem>>, vector<32x256xf32>
    %c0_72 = arith.constant 0 : index
    %c0_73 = arith.constant 0 : index
    %139 = vector.load %arg10[%c0_72, %c0_73] : memref<1x32xf32, #tpu.memory_space<vmem>>, vector<1x32xf32>
    %cst_74 = arith.constant 0.000000e+00 : f32
    %140 = vector.broadcast %cst_74 : f32 to vector<4x32xf32>
    %c0_i32 = arith.constant 0 : i32
    %cst_75 = arith.constant dense<0.000000e+00> : vector<4x256xf32>
    %141 = tpu.matmul %140, %138, %cst_75 {dimension_numbers = #tpu.dot_dimension_numbers<[1], [0], [0], [1], [0, 0, 1, 1], [], []>} : vector<4x32xf32>, vector<32x256xf32>, vector<4x256xf32> -> vector<4x256xf32>
    %142 = arith.index_cast %c0_i32 : i32 to index
    %c0_76 = arith.constant 0 : index
    %c0_77 = arith.constant 0 : index
    %143 = vector.load %arg15[%142, %c0_76, %c0_77] : memref<8x4x256xf32, #tpu.memory_space<vmem>>, vector<1x4x256xf32>
    %144 = vector.shape_cast %143 : vector<1x4x256xf32> to vector<4x256xf32>
    %145 = vector.extract_strided_slice %144 {offsets = [0, 0], sizes = [4, 32], strides = [1, 1]} : vector<4x256xf32> to vector<4x32xf32>
    %146 = vector.extract_strided_slice %141 {offsets = [0, 0], sizes = [4, 32], strides = [1, 1]} : vector<4x256xf32> to vector<4x32xf32>
    %147 = arith.addf %145, %146 : vector<4x32xf32>
    %148 = arith.negf %147 : vector<4x32xf32>
    %149 = math.exp %148 : vector<4x32xf32>
    %cst_78 = arith.constant 1.000000e+00 : f32
    %150 = vector.broadcast %cst_78 : f32 to vector<4x32xf32>
    %151 = arith.addf %150, %149 : vector<4x32xf32>
    %152 = arith.divf %150, %151 : vector<4x32xf32>
    %153 = vector.extract_strided_slice %144 {offsets = [0, 128], sizes = [4, 32], strides = [1, 1]} : vector<4x256xf32> to vector<4x32xf32>
    %154 = vector.extract_strided_slice %141 {offsets = [0, 128], sizes = [4, 32], strides = [1, 1]} : vector<4x256xf32> to vector<4x32xf32>
    %155 = vector.broadcast %139 : vector<1x32xf32> to vector<4x32xf32>
    %156 = arith.addf %154, %155 : vector<4x32xf32>
    %157 = arith.mulf %152, %156 : vector<4x32xf32>
    %158 = arith.addf %153, %157 : vector<4x32xf32>
    %159 = math.tanh %158 : vector<4x32xf32>
    %160 = arith.index_cast %c0_i32 : i32 to index
    %c0_79 = arith.constant 0 : index
    %c0_80 = arith.constant 0 : index
    %161 = vector.load %arg16[%160, %c0_79, %c0_80] : memref<8x4x32xf32, #tpu.memory_space<vmem>>, vector<1x4x32xf32>
    %162 = vector.shape_cast %161 : vector<1x4x32xf32> to vector<4x32xf32>
    %163 = arith.subf %159, %140 : vector<4x32xf32>
    %164 = arith.mulf %162, %163 : vector<4x32xf32>
    %165 = arith.addf %140, %164 : vector<4x32xf32>
    %c1_i32 = arith.constant 1 : i32
    %cst_81 = arith.constant dense<0.000000e+00> : vector<4x256xf32>
    %166 = tpu.matmul %165, %138, %cst_81 {dimension_numbers = #tpu.dot_dimension_numbers<[1], [0], [0], [1], [0, 0, 1, 1], [], []>} : vector<4x32xf32>, vector<32x256xf32>, vector<4x256xf32> -> vector<4x256xf32>
    %167 = arith.index_cast %c1_i32 : i32 to index
    %c0_82 = arith.constant 0 : index
    %c0_83 = arith.constant 0 : index
    %168 = vector.load %arg15[%167, %c0_82, %c0_83] : memref<8x4x256xf32, #tpu.memory_space<vmem>>, vector<1x4x256xf32>
    %169 = vector.shape_cast %168 : vector<1x4x256xf32> to vector<4x256xf32>
    %170 = vector.extract_strided_slice %169 {offsets = [0, 0], sizes = [4, 32], strides = [1, 1]} : vector<4x256xf32> to vector<4x32xf32>
    %171 = vector.extract_strided_slice %166 {offsets = [0, 0], sizes = [4, 32], strides = [1, 1]} : vector<4x256xf32> to vector<4x32xf32>
    %172 = arith.addf %170, %171 : vector<4x32xf32>
    %173 = arith.negf %172 : vector<4x32xf32>
    %174 = math.exp %173 : vector<4x32xf32>
    %cst_84 = arith.constant 1.000000e+00 : f32
    %175 = vector.broadcast %cst_84 : f32 to vector<4x32xf32>
    %176 = arith.addf %175, %174 : vector<4x32xf32>
    %177 = arith.divf %175, %176 : vector<4x32xf32>
    %178 = vector.extract_strided_slice %169 {offsets = [0, 128], sizes = [4, 32], strides = [1, 1]} : vector<4x256xf32> to vector<4x32xf32>
    %179 = vector.extract_strided_slice %166 {offsets = [0, 128], sizes = [4, 32], strides = [1, 1]} : vector<4x256xf32> to vector<4x32xf32>
    %180 = vector.broadcast %139 : vector<1x32xf32> to vector<4x32xf32>
    %181 = arith.addf %179, %180 : vector<4x32xf32>
    %182 = arith.mulf %177, %181 : vector<4x32xf32>
    %183 = arith.addf %178, %182 : vector<4x32xf32>
    %184 = math.tanh %183 : vector<4x32xf32>
    %185 = arith.index_cast %c1_i32 : i32 to index
    %c0_85 = arith.constant 0 : index
    %c0_86 = arith.constant 0 : index
    %186 = vector.load %arg16[%185, %c0_85, %c0_86] : memref<8x4x32xf32, #tpu.memory_space<vmem>>, vector<1x4x32xf32>
    %187 = vector.shape_cast %186 : vector<1x4x32xf32> to vector<4x32xf32>
    %188 = arith.subf %184, %165 : vector<4x32xf32>
    %189 = arith.mulf %187, %188 : vector<4x32xf32>
    %190 = arith.addf %165, %189 : vector<4x32xf32>
    %c2_i32 = arith.constant 2 : i32
    %cst_87 = arith.constant dense<0.000000e+00> : vector<4x256xf32>
    %191 = tpu.matmul %190, %138, %cst_87 {dimension_numbers = #tpu.dot_dimension_numbers<[1], [0], [0], [1], [0, 0, 1, 1], [], []>} : vector<4x32xf32>, vector<32x256xf32>, vector<4x256xf32> -> vector<4x256xf32>
    %192 = arith.index_cast %c2_i32 : i32 to index
    %c0_88 = arith.constant 0 : index
    %c0_89 = arith.constant 0 : index
    %193 = vector.load %arg15[%192, %c0_88, %c0_89] : memref<8x4x256xf32, #tpu.memory_space<vmem>>, vector<1x4x256xf32>
    %194 = vector.shape_cast %193 : vector<1x4x256xf32> to vector<4x256xf32>
    %195 = vector.extract_strided_slice %194 {offsets = [0, 0], sizes = [4, 32], strides = [1, 1]} : vector<4x256xf32> to vector<4x32xf32>
    %196 = vector.extract_strided_slice %191 {offsets = [0, 0], sizes = [4, 32], strides = [1, 1]} : vector<4x256xf32> to vector<4x32xf32>
    %197 = arith.addf %195, %196 : vector<4x32xf32>
    %198 = arith.negf %197 : vector<4x32xf32>
    %199 = math.exp %198 : vector<4x32xf32>
    %cst_90 = arith.constant 1.000000e+00 : f32
    %200 = vector.broadcast %cst_90 : f32 to vector<4x32xf32>
    %201 = arith.addf %200, %199 : vector<4x32xf32>
    %202 = arith.divf %200, %201 : vector<4x32xf32>
    %203 = vector.extract_strided_slice %194 {offsets = [0, 128], sizes = [4, 32], strides = [1, 1]} : vector<4x256xf32> to vector<4x32xf32>
    %204 = vector.extract_strided_slice %191 {offsets = [0, 128], sizes = [4, 32], strides = [1, 1]} : vector<4x256xf32> to vector<4x32xf32>
    %205 = vector.broadcast %139 : vector<1x32xf32> to vector<4x32xf32>
    %206 = arith.addf %204, %205 : vector<4x32xf32>
    %207 = arith.mulf %202, %206 : vector<4x32xf32>
    %208 = arith.addf %203, %207 : vector<4x32xf32>
    %209 = math.tanh %208 : vector<4x32xf32>
    %210 = arith.index_cast %c2_i32 : i32 to index
    %c0_91 = arith.constant 0 : index
    %c0_92 = arith.constant 0 : index
    %211 = vector.load %arg16[%210, %c0_91, %c0_92] : memref<8x4x32xf32, #tpu.memory_space<vmem>>, vector<1x4x32xf32>
    %212 = vector.shape_cast %211 : vector<1x4x32xf32> to vector<4x32xf32>
    %213 = arith.subf %209, %190 : vector<4x32xf32>
    %214 = arith.mulf %212, %213 : vector<4x32xf32>
    %215 = arith.addf %190, %214 : vector<4x32xf32>
    %c3_i32 = arith.constant 3 : i32
    %cst_93 = arith.constant dense<0.000000e+00> : vector<4x256xf32>
    %216 = tpu.matmul %215, %138, %cst_93 {dimension_numbers = #tpu.dot_dimension_numbers<[1], [0], [0], [1], [0, 0, 1, 1], [], []>} : vector<4x32xf32>, vector<32x256xf32>, vector<4x256xf32> -> vector<4x256xf32>
    %217 = arith.index_cast %c3_i32 : i32 to index
    %c0_94 = arith.constant 0 : index
    %c0_95 = arith.constant 0 : index
    %218 = vector.load %arg15[%217, %c0_94, %c0_95] : memref<8x4x256xf32, #tpu.memory_space<vmem>>, vector<1x4x256xf32>
    %219 = vector.shape_cast %218 : vector<1x4x256xf32> to vector<4x256xf32>
    %220 = vector.extract_strided_slice %219 {offsets = [0, 0], sizes = [4, 32], strides = [1, 1]} : vector<4x256xf32> to vector<4x32xf32>
    %221 = vector.extract_strided_slice %216 {offsets = [0, 0], sizes = [4, 32], strides = [1, 1]} : vector<4x256xf32> to vector<4x32xf32>
    %222 = arith.addf %220, %221 : vector<4x32xf32>
    %223 = arith.negf %222 : vector<4x32xf32>
    %224 = math.exp %223 : vector<4x32xf32>
    %cst_96 = arith.constant 1.000000e+00 : f32
    %225 = vector.broadcast %cst_96 : f32 to vector<4x32xf32>
    %226 = arith.addf %225, %224 : vector<4x32xf32>
    %227 = arith.divf %225, %226 : vector<4x32xf32>
    %228 = vector.extract_strided_slice %219 {offsets = [0, 128], sizes = [4, 32], strides = [1, 1]} : vector<4x256xf32> to vector<4x32xf32>
    %229 = vector.extract_strided_slice %216 {offsets = [0, 128], sizes = [4, 32], strides = [1, 1]} : vector<4x256xf32> to vector<4x32xf32>
    %230 = vector.broadcast %139 : vector<1x32xf32> to vector<4x32xf32>
    %231 = arith.addf %229, %230 : vector<4x32xf32>
    %232 = arith.mulf %227, %231 : vector<4x32xf32>
    %233 = arith.addf %228, %232 : vector<4x32xf32>
    %234 = math.tanh %233 : vector<4x32xf32>
    %235 = arith.index_cast %c3_i32 : i32 to index
    %c0_97 = arith.constant 0 : index
    %c0_98 = arith.constant 0 : index
    %236 = vector.load %arg16[%235, %c0_97, %c0_98] : memref<8x4x32xf32, #tpu.memory_space<vmem>>, vector<1x4x32xf32>
    %237 = vector.shape_cast %236 : vector<1x4x32xf32> to vector<4x32xf32>
    %238 = arith.subf %234, %215 : vector<4x32xf32>
    %239 = arith.mulf %237, %238 : vector<4x32xf32>
    %240 = arith.addf %215, %239 : vector<4x32xf32>
    %c4_i32 = arith.constant 4 : i32
    %cst_99 = arith.constant dense<0.000000e+00> : vector<4x256xf32>
    %241 = tpu.matmul %240, %138, %cst_99 {dimension_numbers = #tpu.dot_dimension_numbers<[1], [0], [0], [1], [0, 0, 1, 1], [], []>} : vector<4x32xf32>, vector<32x256xf32>, vector<4x256xf32> -> vector<4x256xf32>
    %242 = arith.index_cast %c4_i32 : i32 to index
    %c0_100 = arith.constant 0 : index
    %c0_101 = arith.constant 0 : index
    %243 = vector.load %arg15[%242, %c0_100, %c0_101] : memref<8x4x256xf32, #tpu.memory_space<vmem>>, vector<1x4x256xf32>
    %244 = vector.shape_cast %243 : vector<1x4x256xf32> to vector<4x256xf32>
    %245 = vector.extract_strided_slice %244 {offsets = [0, 0], sizes = [4, 32], strides = [1, 1]} : vector<4x256xf32> to vector<4x32xf32>
    %246 = vector.extract_strided_slice %241 {offsets = [0, 0], sizes = [4, 32], strides = [1, 1]} : vector<4x256xf32> to vector<4x32xf32>
    %247 = arith.addf %245, %246 : vector<4x32xf32>
    %248 = arith.negf %247 : vector<4x32xf32>
    %249 = math.exp %248 : vector<4x32xf32>
    %cst_102 = arith.constant 1.000000e+00 : f32
    %250 = vector.broadcast %cst_102 : f32 to vector<4x32xf32>
    %251 = arith.addf %250, %249 : vector<4x32xf32>
    %252 = arith.divf %250, %251 : vector<4x32xf32>
    %253 = vector.extract_strided_slice %244 {offsets = [0, 128], sizes = [4, 32], strides = [1, 1]} : vector<4x256xf32> to vector<4x32xf32>
    %254 = vector.extract_strided_slice %241 {offsets = [0, 128], sizes = [4, 32], strides = [1, 1]} : vector<4x256xf32> to vector<4x32xf32>
    %255 = vector.broadcast %139 : vector<1x32xf32> to vector<4x32xf32>
    %256 = arith.addf %254, %255 : vector<4x32xf32>
    %257 = arith.mulf %252, %256 : vector<4x32xf32>
    %258 = arith.addf %253, %257 : vector<4x32xf32>
    %259 = math.tanh %258 : vector<4x32xf32>
    %260 = arith.index_cast %c4_i32 : i32 to index
    %c0_103 = arith.constant 0 : index
    %c0_104 = arith.constant 0 : index
    %261 = vector.load %arg16[%260, %c0_103, %c0_104] : memref<8x4x32xf32, #tpu.memory_space<vmem>>, vector<1x4x32xf32>
    %262 = vector.shape_cast %261 : vector<1x4x32xf32> to vector<4x32xf32>
    %263 = arith.subf %259, %240 : vector<4x32xf32>
    %264 = arith.mulf %262, %263 : vector<4x32xf32>
    %265 = arith.addf %240, %264 : vector<4x32xf32>
    %c5_i32 = arith.constant 5 : i32
    %cst_105 = arith.constant dense<0.000000e+00> : vector<4x256xf32>
    %266 = tpu.matmul %265, %138, %cst_105 {dimension_numbers = #tpu.dot_dimension_numbers<[1], [0], [0], [1], [0, 0, 1, 1], [], []>} : vector<4x32xf32>, vector<32x256xf32>, vector<4x256xf32> -> vector<4x256xf32>
    %267 = arith.index_cast %c5_i32 : i32 to index
    %c0_106 = arith.constant 0 : index
    %c0_107 = arith.constant 0 : index
    %268 = vector.load %arg15[%267, %c0_106, %c0_107] : memref<8x4x256xf32, #tpu.memory_space<vmem>>, vector<1x4x256xf32>
    %269 = vector.shape_cast %268 : vector<1x4x256xf32> to vector<4x256xf32>
    %270 = vector.extract_strided_slice %269 {offsets = [0, 0], sizes = [4, 32], strides = [1, 1]} : vector<4x256xf32> to vector<4x32xf32>
    %271 = vector.extract_strided_slice %266 {offsets = [0, 0], sizes = [4, 32], strides = [1, 1]} : vector<4x256xf32> to vector<4x32xf32>
    %272 = arith.addf %270, %271 : vector<4x32xf32>
    %273 = arith.negf %272 : vector<4x32xf32>
    %274 = math.exp %273 : vector<4x32xf32>
    %cst_108 = arith.constant 1.000000e+00 : f32
    %275 = vector.broadcast %cst_108 : f32 to vector<4x32xf32>
    %276 = arith.addf %275, %274 : vector<4x32xf32>
    %277 = arith.divf %275, %276 : vector<4x32xf32>
    %278 = vector.extract_strided_slice %269 {offsets = [0, 128], sizes = [4, 32], strides = [1, 1]} : vector<4x256xf32> to vector<4x32xf32>
    %279 = vector.extract_strided_slice %266 {offsets = [0, 128], sizes = [4, 32], strides = [1, 1]} : vector<4x256xf32> to vector<4x32xf32>
    %280 = vector.broadcast %139 : vector<1x32xf32> to vector<4x32xf32>
    %281 = arith.addf %279, %280 : vector<4x32xf32>
    %282 = arith.mulf %277, %281 : vector<4x32xf32>
    %283 = arith.addf %278, %282 : vector<4x32xf32>
    %284 = math.tanh %283 : vector<4x32xf32>
    %285 = arith.index_cast %c5_i32 : i32 to index
    %c0_109 = arith.constant 0 : index
    %c0_110 = arith.constant 0 : index
    %286 = vector.load %arg16[%285, %c0_109, %c0_110] : memref<8x4x32xf32, #tpu.memory_space<vmem>>, vector<1x4x32xf32>
    %287 = vector.shape_cast %286 : vector<1x4x32xf32> to vector<4x32xf32>
    %288 = arith.subf %284, %265 : vector<4x32xf32>
    %289 = arith.mulf %287, %288 : vector<4x32xf32>
    %290 = arith.addf %265, %289 : vector<4x32xf32>
    %c6_i32 = arith.constant 6 : i32
    %cst_111 = arith.constant dense<0.000000e+00> : vector<4x256xf32>
    %291 = tpu.matmul %290, %138, %cst_111 {dimension_numbers = #tpu.dot_dimension_numbers<[1], [0], [0], [1], [0, 0, 1, 1], [], []>} : vector<4x32xf32>, vector<32x256xf32>, vector<4x256xf32> -> vector<4x256xf32>
    %292 = arith.index_cast %c6_i32 : i32 to index
    %c0_112 = arith.constant 0 : index
    %c0_113 = arith.constant 0 : index
    %293 = vector.load %arg15[%292, %c0_112, %c0_113] : memref<8x4x256xf32, #tpu.memory_space<vmem>>, vector<1x4x256xf32>
    %294 = vector.shape_cast %293 : vector<1x4x256xf32> to vector<4x256xf32>
    %295 = vector.extract_strided_slice %294 {offsets = [0, 0], sizes = [4, 32], strides = [1, 1]} : vector<4x256xf32> to vector<4x32xf32>
    %296 = vector.extract_strided_slice %291 {offsets = [0, 0], sizes = [4, 32], strides = [1, 1]} : vector<4x256xf32> to vector<4x32xf32>
    %297 = arith.addf %295, %296 : vector<4x32xf32>
    %298 = arith.negf %297 : vector<4x32xf32>
    %299 = math.exp %298 : vector<4x32xf32>
    %cst_114 = arith.constant 1.000000e+00 : f32
    %300 = vector.broadcast %cst_114 : f32 to vector<4x32xf32>
    %301 = arith.addf %300, %299 : vector<4x32xf32>
    %302 = arith.divf %300, %301 : vector<4x32xf32>
    %303 = vector.extract_strided_slice %294 {offsets = [0, 128], sizes = [4, 32], strides = [1, 1]} : vector<4x256xf32> to vector<4x32xf32>
    %304 = vector.extract_strided_slice %291 {offsets = [0, 128], sizes = [4, 32], strides = [1, 1]} : vector<4x256xf32> to vector<4x32xf32>
    %305 = vector.broadcast %139 : vector<1x32xf32> to vector<4x32xf32>
    %306 = arith.addf %304, %305 : vector<4x32xf32>
    %307 = arith.mulf %302, %306 : vector<4x32xf32>
    %308 = arith.addf %303, %307 : vector<4x32xf32>
    %309 = math.tanh %308 : vector<4x32xf32>
    %310 = arith.index_cast %c6_i32 : i32 to index
    %c0_115 = arith.constant 0 : index
    %c0_116 = arith.constant 0 : index
    %311 = vector.load %arg16[%310, %c0_115, %c0_116] : memref<8x4x32xf32, #tpu.memory_space<vmem>>, vector<1x4x32xf32>
    %312 = vector.shape_cast %311 : vector<1x4x32xf32> to vector<4x32xf32>
    %313 = arith.subf %309, %290 : vector<4x32xf32>
    %314 = arith.mulf %312, %313 : vector<4x32xf32>
    %315 = arith.addf %290, %314 : vector<4x32xf32>
    %c7_i32 = arith.constant 7 : i32
    %cst_117 = arith.constant dense<0.000000e+00> : vector<4x256xf32>
    %316 = tpu.matmul %315, %138, %cst_117 {dimension_numbers = #tpu.dot_dimension_numbers<[1], [0], [0], [1], [0, 0, 1, 1], [], []>} : vector<4x32xf32>, vector<32x256xf32>, vector<4x256xf32> -> vector<4x256xf32>
    %317 = arith.index_cast %c7_i32 : i32 to index
    %c0_118 = arith.constant 0 : index
    %c0_119 = arith.constant 0 : index
    %318 = vector.load %arg15[%317, %c0_118, %c0_119] : memref<8x4x256xf32, #tpu.memory_space<vmem>>, vector<1x4x256xf32>
    %319 = vector.shape_cast %318 : vector<1x4x256xf32> to vector<4x256xf32>
    %320 = vector.extract_strided_slice %319 {offsets = [0, 0], sizes = [4, 32], strides = [1, 1]} : vector<4x256xf32> to vector<4x32xf32>
    %321 = vector.extract_strided_slice %316 {offsets = [0, 0], sizes = [4, 32], strides = [1, 1]} : vector<4x256xf32> to vector<4x32xf32>
    %322 = arith.addf %320, %321 : vector<4x32xf32>
    %323 = arith.negf %322 : vector<4x32xf32>
    %324 = math.exp %323 : vector<4x32xf32>
    %cst_120 = arith.constant 1.000000e+00 : f32
    %325 = vector.broadcast %cst_120 : f32 to vector<4x32xf32>
    %326 = arith.addf %325, %324 : vector<4x32xf32>
    %327 = arith.divf %325, %326 : vector<4x32xf32>
    %328 = vector.extract_strided_slice %319 {offsets = [0, 128], sizes = [4, 32], strides = [1, 1]} : vector<4x256xf32> to vector<4x32xf32>
    %329 = vector.extract_strided_slice %316 {offsets = [0, 128], sizes = [4, 32], strides = [1, 1]} : vector<4x256xf32> to vector<4x32xf32>
    %330 = vector.broadcast %139 : vector<1x32xf32> to vector<4x32xf32>
    %331 = arith.addf %329, %330 : vector<4x32xf32>
    %332 = arith.mulf %327, %331 : vector<4x32xf32>
    %333 = arith.addf %328, %332 : vector<4x32xf32>
    %334 = math.tanh %333 : vector<4x32xf32>
    %335 = arith.index_cast %c7_i32 : i32 to index
    %c0_121 = arith.constant 0 : index
    %c0_122 = arith.constant 0 : index
    %336 = vector.load %arg16[%335, %c0_121, %c0_122] : memref<8x4x32xf32, #tpu.memory_space<vmem>>, vector<1x4x32xf32>
    %337 = vector.shape_cast %336 : vector<1x4x32xf32> to vector<4x32xf32>
    %338 = arith.subf %334, %315 : vector<4x32xf32>
    %339 = arith.mulf %337, %338 : vector<4x32xf32>
    %340 = arith.addf %315, %339 : vector<4x32xf32>
    %c8_i32 = arith.constant 8 : i32
    %341 = vector.shape_cast %2 : vector<4x1x32xf32> to vector<4x32xf32>
    %342 = vector.shape_cast %1 : vector<4x1x32xf32> to vector<4x32xf32>
    %343 = tpu.concatenate %341, %340, %342 in 1 : vector<4x32xf32>, vector<4x32xf32>, vector<4x32xf32> -> vector<4x96xf32>
    %c0_123 = arith.constant 0 : index
    %c0_124 = arith.constant 0 : index
    %344 = vector.load %arg11[%c0_123, %c0_124] : memref<96x32xf32, #tpu.memory_space<vmem>>, vector<96x32xf32>
    %cst_125 = arith.constant dense<0.000000e+00> : vector<4x32xf32>
    %345 = tpu.matmul %343, %344, %cst_125 {dimension_numbers = #tpu.dot_dimension_numbers<[1], [0], [0], [1], [0, 0, 1, 1], [], []>} : vector<4x96xf32>, vector<96x32xf32>, vector<4x32xf32> -> vector<4x32xf32>
    %c0_126 = arith.constant 0 : index
    %c0_127 = arith.constant 0 : index
    %346 = vector.load %arg12[%c0_126, %c0_127] : memref<1x32xf32, #tpu.memory_space<vmem>>, vector<1x32xf32>
    %347 = vector.broadcast %346 : vector<1x32xf32> to vector<4x32xf32>
    %348 = arith.addf %345, %347 : vector<4x32xf32>
    %cst_128 = arith.constant 0.000000e+00 : f32
    %349 = vector.broadcast %cst_128 : f32 to vector<4x32xf32>
    %350 = arith.maximumf %348, %349 : vector<4x32xf32>
    %351 = vector.shape_cast %350 : vector<4x32xf32> to vector<4x1x32xf32>
    %c0_129 = arith.constant 0 : index
    %c0_130 = arith.constant 0 : index
    %c0_131 = arith.constant 0 : index
    %352 = vector.load %arg13[%c0_129, %c0_130, %c0_131] : memref<4x1x32xf32, #tpu.memory_space<vmem>>, vector<4x1x32xf32>
    tpu.vector_store %arg13[%c0_129, %c0_130, %c0_131], %351 {strides = array<i32>} : memref<4x1x32xf32, #tpu.memory_space<vmem>>, vector<4x1x32xf32>,
    return
  }
  func.func @transform_0(%arg0: i32) -> (i32, i32, i32) {
    %c0_i32 = arith.constant 0 : i32
    %c0_i32_0 = arith.constant 0 : i32
    %c0_i32_1 = arith.constant 0 : i32
    return %arg0, %c0_i32, %c0_i32_0 : i32, i32, i32
  }
  func.func @transform_1(%arg0: i32) -> (i32, i32, i32) {
    %c0_i32 = arith.constant 0 : i32
    %c0_i32_0 = arith.constant 0 : i32
    %c0_i32_1 = arith.constant 0 : i32
    return %arg0, %c0_i32, %c0_i32_0 : i32, i32, i32
  }
  func.func @transform_2(%arg0: i32) -> (i32, i32, i32) {
    %c0_i32 = arith.constant 0 : i32
    %c0_i32_0 = arith.constant 0 : i32
    %c0_i32_1 = arith.constant 0 : i32
    return %arg0, %c0_i32, %c0_i32_0 : i32, i32, i32
  }
  func.func @transform_3(%arg0: i32) -> (i32, i32) {
    %c0_i32 = arith.constant 0 : i32
    %c0_i32_0 = arith.constant 0 : i32
    %c0_i32_1 = arith.constant 0 : i32
    return %c0_i32, %c0_i32_0 : i32, i32
  }
  func.func @transform_4(%arg0: i32) -> (i32, i32) {
    %c0_i32 = arith.constant 0 : i32
    %c0_i32_0 = arith.constant 0 : i32
    %c0_i32_1 = arith.constant 0 : i32
    return %c0_i32, %c0_i32_0 : i32, i32
  }
  func.func @transform_5(%arg0: i32) -> (i32, i32) {
    %c0_i32 = arith.constant 0 : i32
    %c0_i32_0 = arith.constant 0 : i32
    %c0_i32_1 = arith.constant 0 : i32
    return %c0_i32, %c0_i32_0 : i32, i32
  }
  func.func @transform_6(%arg0: i32) -> (i32, i32) {
    %c0_i32 = arith.constant 0 : i32
    %c0_i32_0 = arith.constant 0 : i32
    %c0_i32_1 = arith.constant 0 : i32
    return %c0_i32, %c0_i32_0 : i32, i32
  }
  func.func @transform_7(%arg0: i32) -> (i32, i32) {
    %c0_i32 = arith.constant 0 : i32
    %c0_i32_0 = arith.constant 0 : i32
    %c0_i32_1 = arith.constant 0 : i32
    return %c0_i32, %c0_i32_0 : i32, i32
  }
  func.func @transform_8(%arg0: i32) -> (i32, i32) {
    %c0_i32 = arith.constant 0 : i32
    %c0_i32_0 = arith.constant 0 : i32
    %c0_i32_1 = arith.constant 0 : i32
    return %c0_i32, %c0_i32_0 : i32, i32
  }
  func.func @transform_9(%arg0: i32) -> (i32, i32) {
    %c0_i32 = arith.constant 0 : i32
    %c0_i32_0 = arith.constant 0 : i32
    %c0_i32_1 = arith.constant 0 : i32
    return %c0_i32, %c0_i32_0 : i32, i32
  }
  func.func @transform_10(%arg0: i32) -> (i32, i32) {
    %c0_i32 = arith.constant 0 : i32
    %c0_i32_0 = arith.constant 0 : i32
    %c0_i32_1 = arith.constant 0 : i32
    return %c0_i32, %c0_i32_0 : i32, i32
  }
  func.func @transform_11(%arg0: i32) -> (i32, i32) {
    %c0_i32 = arith.constant 0 : i32
    %c0_i32_0 = arith.constant 0 : i32
    %c0_i32_1 = arith.constant 0 : i32
    return %c0_i32, %c0_i32_0 : i32, i32
  }
  func.func @transform_12(%arg0: i32) -> (i32, i32, i32) {
    %c0_i32 = arith.constant 0 : i32
    %c0_i32_0 = arith.constant 0 : i32
    %c0_i32_1 = arith.constant 0 : i32
    return %arg0, %c0_i32, %c0_i32_0 : i32, i32, i32
  }
}

</mosaic_0001>

<bundles_post_ra>
// kernel: tpu_custom_call.1
= control target key start
LH: loop header
LB: loop body
LE: loop exit
PB: predicated region body
PF: predicated region fallthrough
CT: control target
= control target key end

     0   :  { %s3418_s0 = inlined_call_operand.vmem [shape: f32[8,8,32], index: 0, kind: input, shape index: {}]   ;;  %s3419_s1 = inlined_call_operand.vmem [shape: f32[8,1,32], index: 1, kind: input, shape index: {}]   ;;  %s3420_s2 = inlined_call_operand.vmem [shape: f32[8,1,32], index: 2, kind: input, shape index: {}]   ;;  %s3421_s3 = inlined_call_operand.vmem [shape: f32[128,32], index: 3, kind: input, shape index: {}]   ;;  %s3422_s4 = inlined_call_operand.vmem [shape: f32[1,32], index: 4, kind: input, shape index: {}]   ;;  %s3423_s5 = inlined_call_operand.vmem [shape: f32[1,32], index: 5, kind: input, shape index: {}]   ;;  %s3424_s6 = inlined_call_operand.vmem [shape: f32[32,256], index: 6, kind: input, shape index: {}]   ;;  %s3425_s7 = inlined_call_operand.vmem [shape: f32[1,256], index: 7, kind: input, shape index: {}]   ;;  %s3426_s8 = inlined_call_operand.vmem [shape: f32[32,256], index: 8, kind: input, shape index: {}]   ;;  %s3427_s9 = inlined_call_operand.vmem [shape: f32[1,32], index: 9, kind: input, shape index: {}]   ;;  %s3428_s10 = inlined_call_operand.vmem [shape: f32[96,32], index: 10, kind: input, shape index: {}]   ;;  %s3429_s11 = inlined_call_operand.vmem [shape: f32[1,32], index: 11, kind: input, shape index: {}]   ;;  %s3430_s12 = inlined_call_operand.hbm [shape: f32[8,1,32], index: 12, kind: output, shape index: {}]  }
   0x1   :  { %3435 = sst [smem:[#allocation11_spill]] %s3420_s2 }
   0x2   :  { %17 = vsyncpa [#allocation6], 0 }
   0x3   :  { %19 = vsyncpa [#allocation6 + $0x1], 0  ;;  %s2754_s21 = smov 0   ;;  %s2756_s22 = smov 0  }
   0x4   :  { %s2758_s23 = smov 0   ;;  %s2760_s24 = smov 0  }
   0x5 LB: > { %3436 = sst [smem:[#allocation8_spill]] %s2672_s23  ;;  %s2775_s25 = sadd.s32 4294967295, %s2676_s24   ;;  %s2676_s24 = sphi %s2760_s24, %s3451_s24   ;;  %s2672_s23 = sphi %s2758_s23, %s3453_s23   ;;  %s2668_s22 = sphi %s2756_s22, %s3455_s22   ;;  %s2664_s21 = sphi %s2754_s21, %s3454_s21  }
   0x6   : > { %s2232_s26 = sadd.s32 4294967294, %s2676_s24   ;;  %s2779_s27 = sadd.s32 1, %s2676_s24  }
   0x7   : > { %3437 = sst [smem:[#allocation9_spill]] %s2779_s27  ;;  %s299_s28 = sadd.s32 1, %s2672_s23 }
   0x8   : > { %s296_s29 = ssub.s32 %s2676_s24, %s2779_s27  ;;  %p309_p0 = scmp.ne.s32.totalorder %s2672_s23, %s2668_s22 }
   0x9   : > { %p297_p1 = scmp.eq.s32.totalorder %s296_s29, 0  ;;  %p310_p2 = scmp.eq.s32.totalorder %s2775_s25, 1 }
   0xa   : > { %p315_p3 = scmp.ne.s32.totalorder %s2668_s22, %s2664_s21  ;;  %p316_p4 = scmp.eq.s32.totalorder %s2232_s26, 1 }
   0xb   : > { %s2790_s30 = scalar_select %p297_p1, %s2672_s23, %s299_s28  }
   0xc   : > { %p2792_p5 = por %p310_p2, %p309_p0  ;;  %p2796_p6 = por %p316_p4, %p315_p3 }
   0xd   : > { %3438 = sst [smem:[#allocation10_spill]] %s2790_s30  ;;  %p2235_p7 = scmp.ge.s32.totalorder %s2676_s24, 1 }
   0xe   : > { %p386_p8 = scmp.lt.s32.totalorder %s2676_s24, 3 }
  0x10   : > { %p387_p9 = pnand %p2235_p7, %p386_p8 }
  0x11   : > { %s2237_s15 = sshll.u32 (!%p387_p9), %s2775_s25, 2  ;;  %v469_v0 = vlaneseq (!%p387_p9)  ;;  %v609_v1 = vld [vmem:[%s3421_s3] sm:$0xff] (!%p387_p9)  ;;  %v610_v2 = vld [vmem:[%s3421_s3 + $0x8] sm:$0xff] (!%p387_p9)  ;;  %v611_v4 = vld [vmem:[%s3421_s3 + $0x10] sm:$0xff] (!%p387_p9)  ;;  %s3441_s2 = sld [smem:[#allocation11_spill]] (!%p387_p9)  ;;  %vm3434_vm0 = vcmask (!%p387_p9), 261120  }
  0x12   : > { %390 = sbr.rel (%p387_p9) target bundleno = 3349 (0xd15), region = 68  ;;  %p437_p10 = scmp.lt.s32.totalorder (!%p387_p9), %s2237_s15, 7  ;;  %v2369_v3 = vpack.c.bf16 (!%p387_p9), %v610_v2, %v609_v1  ;;  %v612_v5 = vld [vmem:[%s3421_s3 + $0x18] sm:$0xff] (!%p387_p9)  ;;  %v613_v8 = vld [vmem:[%s3421_s3 + $0x20] sm:$0xff] (!%p387_p9)  ;;  %v614_v9 = vld [vmem:[%s3421_s3 + $0x28] sm:$0xff] (!%p387_p9)  ;;  %vm542_vm1 = vcmask (!%p387_p9), 523520  }
  0x13   : > { %v2816_v6 = vshrl.u32 (!%p387_p9), %v469_v0, 7  ;;  %v2373_v7 = vpack.c.bf16 (!%p387_p9), %v612_v5, %v611_v4  ;;  %v2377_v11 = vpack.c.bf16 (!%p387_p9), %v614_v9, %v613_v8  ;;  %v615_v12 = vld [vmem:[%s3421_s3 + $0x30] sm:$0xff] (!%p387_p9)  ;;  %v616_v13 = vld [vmem:[%s3421_s3 + $0x38] sm:$0xff] (!%p387_p9)  ;;  %v617_v35 = vld [vmem:[%s3421_s3 + $0x40] sm:$0xff] (!%p387_p9)  ;;  %s2679_s18 = smov (!%p387_p9), 64   ;;  %s2680_s30 = smov (!%p387_p9), 96  }
  0x14   : > { %2370 = vmatprep.subr.bf16.mxu0 (!%p387_p9), %v2369_v3  ;;  %v2381_v34 = vpack.c.bf16 (!%p387_p9), %v616_v13, %v615_v12  ;;  %v618_v41 = vld [vmem:[%s3421_s3 + $0x48] sm:$0xff] (!%p387_p9)  ;;  %v619_v53 = vld [vmem:[%s3421_s3 + $0x50] sm:$0xff] (!%p387_p9)  ;;  %v620_v54 = vld [vmem:[%s3421_s3 + $0x58] sm:$0xff] (!%p387_p9)  ;;  %vm571_vm2 = vcmask (!%p387_p9), 785920   ;;  %vm600_vm3 = vcmask (!%p387_p9), 1048320   ;;  %vm766_vm4 = vcmask (!%p387_p9), 1041409  }
  0x15   : > { %v2825_v10 = vsub.s32 (!%p387_p9), 0, %v2816_v6  ;;  %2372 = vmatpush3.bf16.msra.mxu0 (!%p387_p9), %v2369_v3  ;;  %v2385_v48 = vpack.c.bf16 (!%p387_p9), %v618_v41, %v617_v35  ;;  %v2389_v58 = vpack.c.bf16 (!%p387_p9), %v620_v54, %v619_v53  ;;  %v621_v61 = vld [vmem:[%s3421_s3 + $0x60] sm:$0xff] (!%p387_p9)  ;;  %v622_v62 = vld [vmem:[%s3421_s3 + $0x68] sm:$0xff] (!%p387_p9)  ;;  %v623_v5 = vld [vmem:[%s3421_s3 + $0x70] sm:$0xff] (!%p387_p9)  ;;  %vm768_vm5 = vcmask (!%p387_p9), 1042434  }
  0x16   : > { %2374 = vmatprep.subr.bf16.mxu0 (!%p387_p9), %v2373_v7  ;;  %v2393_v2 = vpack.c.bf16 (!%p387_p9), %v622_v62, %v621_v61  ;;  %vm770_vm6 = vcmask (!%p387_p9), 1043459   ;;  %vm773_vm7 = vcmask (!%p387_p9), 60416   ;;  %vm1014_vm8 = vcmask (!%p387_p9), 1045509  }
  0x17   : > { %vm1018_vm9 = vcmask (!%p387_p9), 1046534   ;;  %vm1022_vm10 = vcmask (!%p387_p9), 1047559   ;;  %vm1190_vm11 = vcmask (!%p387_p9), 261127   ;;  %vm1011_vm12 = vcmask (!%p387_p9), 1044484  }
  0x18   : > { %vm1148_vm13 = vcmask (!%p387_p9), 261125   ;;  %vm1169_vm14 = vcmask (!%p387_p9), 261126   ;;  %vm1049_vm15 = vcmask (!%p387_p9), 257024  }
  0x19   : > { %s3457_s15 = smov (!%p437_p10, %s2237_s15), 7  ;;  %2376 = vmatpush3.bf16.msra.mxu0 %v2373_v7  ;;  %v624_v7 = vld [vmem:[%s3421_s3 + $0x78] sm:$0xff] }
  0x1a   : > { %s2238_s20 = sshll.u32 %s3457_s15, 3  ;;  %s450_s29 = scalar_lea.vmem %s3441_s2, %s3457_s15  ;;  %2378 = vmatprep.subr.bf16.mxu0 %v2377_v11 }
  0x1b   : > { %s440_s27 = scalar_lea.vmem %s3418_s0, %s2238_s20  ;;  %v2839_v14 = vld [vmem:[%s450_s29] sm:$0x1]  ;;  %v2841_v15 = vld [vmem:[%s450_s29 + $0x1] sm:$0x1]  ;;  %v2843_v16 = vld [vmem:[%s450_s29 + $0x2] sm:$0x1]  ;;  %s445_s2 = scalar_lea.vmem %s3419_s1, %s3457_s15 }
  0x1c   : > { %v2848_v17 = vld [vmem:[%s440_s27] sm:$0xff]  ;;  %v505_v18 = vrot.slane %v2839_v14, %v2825_v10  ;;  %v1952_v19 = vcombine.low %v2839_v14, %v2841_v15  ;;  %v2854_v20 = vld [vmem:[%s440_s27 + $0x18] sm:$0xff]  ;;  %v509_v22 = vrot.slane %v2841_v15, %v2825_v10  ;;  %v2866_v25 = vld [vmem:[%s440_s27 + $0x8] sm:$0xff]  ;;  %v2879_v31 = vrot.slane %v2843_v16, %v2825_v10  ;;  %s2678_s15 = smov 32  }
  0x1d   : > { %v2856_v21 = vld [vmem:[%s450_s29 + $0x3] sm:$0x1]  ;;  %v2868_v26 = vld [vmem:[%s445_s2] sm:$0x1]  ;;  %v2873_v29 = vld [vmem:[%s445_s2 + $0x1] sm:$0x1]  ;;  %2380 = vmatpush3.bf16.msra.mxu0 %v2377_v11  ;;  %v2397_v11 = vpack.c.bf16 %v624_v7, %v623_v5 }
  0x1e   : > { %v2862_v23 = vrot.slane %v2856_v21, %v2825_v10  ;;  %v1953_v24 = vcombine.low %v2843_v16, %v2856_v21  ;;  %v522_v27 = vmul.f32 %v505_v18, %v2848_v17  ;;  %v472_v28 = vrot.slane %v2868_v26, %v2825_v10  ;;  %v2883_v33 = vld [vmem:[%s445_s2 + $0x3] sm:$0x1]  ;;  %v2891_v38 = vld [vmem:[%s440_s27 + $0x10] sm:$0xff]  ;;  %v2895_v40 = vld [vmem:[%s445_s2 + $0x2] sm:$0x1]  ;;  %2382 = vmatprep.subr.bf16.mxu0 %v2381_v34  ;;  %s433_s27 = sand.u32 1, %s2668_s22  }
  0x1f   : > { %v476_v32 = vrot.slane %v2873_v29, %v2825_v10  ;;  %v523_v36 = vmul.f32 %v509_v22, %v2866_v25  ;;  %v1981_v39 = vcombine.low %v2868_v26, %v2873_v29  ;;  %v1982_v43 = vcombine.low %v2895_v40, %v2883_v33  ;;  %v2011_v14 = vld [vmem:[%s3428_s10] sm:$0xff]  ;;  %v2012_v15 = vld [vmem:[%s3428_s10 + $0x8] sm:$0xff]  ;;  %v2013_v16 = vld [vmem:[%s3428_s10 + $0x10] sm:$0xff] }
  0x20   : > { %v525_v30 = vmul.f32 %v2862_v23, %v2854_v20  ;;  %530 = vrot.lane.b32.xlu0 %v522_v27, %s2678_s15  ;;  %v547_v37 = vsub.f32 %v2848_v17, %v472_v28  ;;  %v484_v45 = vrot.slane %v2883_v33, %v2825_v10  ;;  %v524_v46 = vmul.f32 %v2879_v31, %v2891_v38  ;;  %v2014_v29 = vld [vmem:[%s3428_s10 + $0x18] sm:$0xff] }
  0x21   : > { %v548_v42 = vsub.f32 %v2866_v25, %v476_v32  ;;  %v480_v47 = vrot.slane %v2895_v40, %v2825_v10  ;;  %v576_v49 = vsub.f32 %v2848_v17, %v505_v18  ;;  %v489_v50 = vmul.f32 %v472_v28, %v2848_v17  ;;  %2384 = vmatpush3.bf16.msra.mxu0 %v2381_v34  ;;  %v2016_v40 = vld [vmem:[%s3428_s10 + $0x28] sm:$0xff] }
  0x22   : > { %536 = vrot.lane.b32.xlu1 %v525_v30, %s2678_s15  ;;  %v551_v44 = vand.u32 2147483647, %v547_v37  ;;  %v492_v51 = vmul.f32 %v484_v45, %v2854_v20  ;;  %v490_v52 = vmul.f32 %v476_v32, %v2866_v25  ;;  %v577_v56 = vsub.f32 %v2866_v25, %v509_v22  ;;  %2386 = vmatprep.subr.bf16.mxu0 %v2385_v48 }
  0x23   : > { %v552_v55 = vand.u32 2147483647, %v548_v42  ;;  %v491_v57 = vmul.f32 %v480_v47, %v2891_v38  ;;  %494 = vst.msk [vmem:[#allocation2] sm:$0xff] %vm3434_vm0, %v489_v50  ;;  %v580_v59 = vand.u32 2147483647, %v576_v49  ;;  %v549_v60 = vsub.f32 %v2891_v38, %v480_v47 }
  0x24   : > { %532 = vrot.lane.b32.xlu0 %v523_v36, %s2678_s15  ;;  %497 = vst.msk [vmem:[#allocation2 + $0x18] sm:$0xff] %vm3434_vm0, %v492_v51  ;;  %495 = vst.msk [vmem:[#allocation2 + $0x8] sm:$0xff] %vm3434_vm0, %v490_v52  ;;  %v581_v63 = vand.u32 2147483647, %v577_v56  ;;  %v550_v1 = vsub.f32 %v2854_v20, %v484_v45  ;;  %v578_v4 = vsub.f32 %v2891_v38, %v2879_v31  ;;  %v749_v5 = vand.u32 127, %v469_v0 }
  0x25   : > { %496 = vst.msk [vmem:[#allocation2 + $0x10] sm:$0xff] %vm3434_vm0, %v491_v57  ;;  %2388 = vmatpush3.bf16.msra.mxu0 %v2385_v48  ;;  %v553_v3 = vand.u32 2147483647, %v549_v60  ;;  %v579_v9 = vsub.f32 %v2854_v20, %v2862_v23  ;;  %v2474_v26 = vpack.c.bf16 %v2012_v15, %v2011_v14  ;;  %v2477_v33 = vpack.c.bf16 %v2014_v29, %v2013_v16 }
  0x26   : > { %559 = vrot.lane.b32.xlu1 %v551_v44, %s2679_s18  ;;  %2390 = vmatprep.subr.bf16.mxu0 %v2389_v58  ;;  %v554_v8 = vand.u32 2147483647, %v550_v1  ;;  %v582_v12 = vand.u32 2147483647, %v578_v4 }
  0x27   : > { %v583_v13 = vand.u32 2147483647, %v579_v9 }
  0x28   : > { %534 = vrot.lane.b32.xlu0 %v524_v46, %s2678_s15  ;;  %v2241_v46 = vld [vmem:[%s3422_s4] ss:$0 sm:$0xff] }
  0x29   : > { %2392 = vmatpush3.bf16.msra.mxu0 %v2389_v58 }
  0x2a   : > { %561 = vrot.lane.b32.xlu1 %v552_v55, %s2679_s18  ;;  %2394 = vmatprep.subr.bf16.mxu0 %v2393_v2  ;;  %v2242_v55 = vld [vmem:[%s3423_s5] ss:$0 sm:$0xff] }
  0x2c   : > { %588 = vrot.lane.b32.xlu0 %v580_v59, %s2680_s30 }
  0x2d   : > { %2396 = vmatpush3.bf16.msra.mxu0 %v2393_v2 }
  0x2e   : > { %590 = vrot.lane.b32.xlu1 %v581_v63, %s2680_s30  ;;  %2398 = vmatprep.subr.bf16.mxu0 %v2397_v11 }
  0x30   : > { %563 = vrot.lane.b32.xlu0 %v553_v3, %s2679_s18 }
  0x31   : > { %2400 = vmatpush3.bf16.msra.mxu0 %v2397_v11 }
  0x32   : > { %565 = vrot.lane.b32.xlu1 %v554_v8, %s2679_s18  ;;  %v2966_v8 = vsub.s32 %v749_v5, %v2816_v6  ;;  %v2682_v5 = vmov 0.0  }
  0x33   : > { %974 = vmatprep.mubr.f32.mxu1 %v2682_v5 }
  0x34   : > { %592 = vrot.lane.b32.xlu0 %v582_v12, %s2680_s30 }
  0x36   : > { %594 = vrot.lane.b32.xlu1 %v583_v13, %s2680_s30  ;;  %s2686_s30 = smov [#allocation5]  }
  0x37   : > { %s2618_s20 = sshll.u32 %s2686_s30, 4  ;;  %s2619_s20 = int_to_ptr.vmem [resolvable:$false] %s2618_s20 }
  0x38   : > { %s2620_s29 = scalar_lea.vmem %s2619_s20, 128 }
  0x92   : > { %v531_v18 = vpop.permute.xlu0 %530 }
  0x93   : > { %543 = vst.msk [vmem:[#allocation2] sm:$0xff] %vm542_vm1, %v531_v18 }
  0x94   : > { %v537_v22 = vpop.permute.xlu1 %536 }
  0x95   : > { %546 = vst.msk [vmem:[#allocation2 + $0x18] sm:$0xff] %vm542_vm1, %v537_v22 }
  0x96   : > { %v533_v23 = vpop.permute.xlu0 %532 }
  0x97   : > { %544 = vst.msk [vmem:[#allocation2 + $0x8] sm:$0xff] %vm542_vm1, %v533_v23 }
  0x98   : > { %v560_v27 = vpop.permute.xlu1 %559 }
  0x99   : > { %572 = vst.msk [vmem:[#allocation2] sm:$0xff] %vm571_vm2, %v560_v27 }
  0x9a   : > { %v535_v28 = vpop.permute.xlu0 %534 }
  0x9b   : > { %545 = vst.msk [vmem:[#allocation2 + $0x10] sm:$0xff] %vm542_vm1, %v535_v28  ;;  %vm1068_vm1 = vcmask 258049  }
  0x9c   : > { %v562_v30 = vpop.permute.xlu1 %561 }
  0x9d   : > { %573 = vst.msk [vmem:[#allocation2 + $0x8] sm:$0xff] %vm571_vm2, %v562_v30 }
  0x9e   : > { %v589_v31 = vpop.permute.xlu0 %588 }
  0x9f   : > { %601 = vst.msk [vmem:[#allocation2] sm:$0xff] %vm600_vm3, %v589_v31  ;;  %v2681_v31 = vmov 0  }
  0xa0   : > { %v591_v32 = vpop.permute.xlu1 %590  ;;  %2541 = vset.pattern.permute.xlu1 %v2681_v31  ;;  %2540 = vset.pattern.permute.xlu0 %v2681_v31 }
  0xa1   : > { %602 = vst.msk [vmem:[#allocation2 + $0x8] sm:$0xff] %vm600_vm3, %v591_v32  ;;  %v879_v32 = vld [vmem:[%s3424_s6 + $0x8] sm:$0xff] }
  0xa2   : > { %v564_v34 = vpop.permute.xlu0 %563 }
  0xa3   : > { %574 = vst.msk [vmem:[#allocation2 + $0x10] sm:$0xff] %vm571_vm2, %v564_v34  ;;  %v881_v34 = vld [vmem:[%s3424_s6 + $0x18] sm:$0xff] }
  0xa4   : > { %v566_v35 = vpop.permute.xlu1 %565 }
  0xa5   : > { %575 = vst.msk [vmem:[#allocation2 + $0x18] sm:$0xff] %vm571_vm2, %v566_v35  ;;  %v878_v35 = vld [vmem:[%s3424_s6] sm:$0xff]  ;;  %vm1087_vm2 = vcmask 259074  }
  0xa6   : > { %v593_v36 = vpop.permute.xlu0 %592  ;;  %v605_v37 = vld [vmem:[#allocation2] sm:$0xff] }
  0xa7   : > { %603 = vst.msk [vmem:[#allocation2 + $0x10] sm:$0xff] %vm600_vm3, %v593_v36  ;;  %2336 = vmatprep.mubr.f32.mxu0 %v605_v37  ;;  %v2401_v36 = vpack.c.bf16 %v881_v34, %v879_v32  ;;  %v880_v37 = vld [vmem:[%s3424_s6 + $0x10] sm:$0xff] }
  0xa8   : > { %v595_v41 = vpop.permute.xlu1 %594  ;;  %v606_v42 = vld [vmem:[#allocation2 + $0x8] sm:$0xff] }
  0xa9   : > { %604 = vst.msk [vmem:[#allocation2 + $0x18] sm:$0xff] %vm600_vm3, %v595_v41  ;;  %2337 = vmatmul.mubr.f32.vlgmr.msra.gmra.mrb[0].mxu0 %v606_v42  ;;  %v2403_v41 = vpack.c.bf16 %v880_v37, %v878_v35  ;;  %2402 = vmatprep.subr.bf16.mxu1 %v2401_v36  ;;  %v2989_v42 = vsub.s32 1, %v2816_v6  ;;  %vm1192_vm3 = vcmask 256000  }
  0xab   : > { %2404 = vmatpush1.bf16.msra.mxu1 %v2403_v41 }
  0xae   : > { %v607_v44 = vld [vmem:[#allocation2 + $0x10] sm:$0xff] }
  0xaf   : > { %2339 = vmatprep.mubr.f32.mxu0 %v607_v44  ;;  %v788_v44 = vsub.s32 2, %v2816_v6 }
  0xb0   : > { %v608_v45 = vld [vmem:[#allocation2 + $0x18] sm:$0xff] }
  0xb1   : > { %2340 = vmatmul.mubr.f32.gmra.mrb[2].mxu0 %v608_v45  ;;  %v792_v45 = vsub.s32 3, %v2816_v6 }
  0xb2   : > { %1647 = vmatprep.mubr.f32.mxu0 %v2682_v5 }
 0x17c   : > { %v2338_v47 = vpop.f32.mrb[0].mxu0 }
 0x17d   : > { %v704_v48 = vadd.f32 %v2338_v47, %v2241_v46  ;;  %v698_v49 = vpop.f32.mrb[1].mxu0 }
 0x17e   : > { %v699_v50 = vadd.f32 %v2241_v46, %v698_v49 }
 0x17f   : > { %2542 = vtanh.f32 %v704_v48 }
 0x180   : > { %2544 = vtanh.f32 %v699_v50 }
 0x184   : > { %v2341_v51 = vpop.f32.mrb[2].mxu0 }
 0x185   : > { %v714_v52 = vadd.f32 %v2341_v51, %v2241_v46  ;;  %v708_v53 = vpop.f32.mrb[3].mxu0 }
 0x186   : > { %v709_v54 = vadd.f32 %v2241_v46, %v708_v53 }
 0x187   : > { %2546 = vtanh.f32 %v714_v52 }
 0x188   : > { %2548 = vtanh.f32 %v709_v54 }
 0x189   : > { %v2543_v56 = vpop.eup %2542 }
 0x18a   : > { %v2545_v57 = vpop.eup %2544  ;;  %v729_v58 = vmul.f32 %v2543_v56, %v2242_v55 }
 0x18b   : > { %v728_v59 = vmul.f32 %v2545_v57, %v2242_v55 }
 0x18c   : > { %v735_v60 = vsel %vm3434_vm0, %v729_v58, 0.0 }
 0x18d   : > { %736 = vadd.xlane.f32.xlu1 %v735_v60  ;;  %v732_v61 = vsel %vm3434_vm0, %v728_v59, 0.0 }
 0x18e   : > { %733 = vadd.xlane.f32.xlu0 %v732_v61  ;;  %v883_v61 = vld [vmem:[%s3424_s6 + $0x28] sm:$0xff] }
 0x191   : > { %v2547_v62 = vpop.eup %2546 }
 0x192   : > { %v2549_v63 = vpop.eup %2548  ;;  %v731_v3 = vmul.f32 %v2547_v62, %v2242_v55  ;;  %v885_v62 = vld [vmem:[%s3424_s6 + $0x38] sm:$0xff] }
 0x193   : > { %v730_v1 = vmul.f32 %v2549_v63, %v2242_v55  ;;  %v2405_v63 = vpack.c.bf16 %v885_v62, %v883_v61 }
 0x194   : > { %v741_v4 = vsel %vm3434_vm0, %v731_v3, 0.0 }
 0x195   : > { %v738_v2 = vsel %vm3434_vm0, %v730_v1, 0.0  ;;  %v882_v1 = vld [vmem:[%s3424_s6 + $0x20] sm:$0xff]  ;;  %2406 = vmatprep.subr.bf16.mxu1 %v2405_v63 }
 0x196   : > { %739 = vadd.xlane.f32.xlu0 %v738_v2  ;;  %v884_v2 = vld [vmem:[%s3424_s6 + $0x30] sm:$0xff] }
 0x197   : > { %v2407_v3 = vpack.c.bf16 %v884_v2, %v882_v1 }
 0x199   : > { %2408 = vmatpush1.bf16.msra.mxu1 %v2407_v3 }
 0x19a   : > { %742 = vadd.xlane.f32.xlu0 %v741_v4 }
 0x19c   : > { %2243 = vmatmul.mubr.msk.f32.vlgmr.msra.gmra.mrb[0].mxu1 %vm3434_vm0, %v2848_v17  ;;  %v1194_v17 = vld [vmem:[%s3426_s8] sm:$0xff] }
 0x19d   : > { %980 = vmatprep.mubr.f32.mxu1 %v2682_v5 }
 0x1a0   : > { %2244 = vmatmul.mubr.msk.f32.gmra.mrb[2].mxu1 %vm3434_vm0, %v2866_v25  ;;  %v1196_v25 = vld [vmem:[%s3426_s8 + $0x10] sm:$0xff] }
 0x1a1   : > { %986 = vmatprep.mubr.f32.mxu1 %v2682_v5 }
 0x1a4   : > { %2245 = vmatmul.mubr.msk.f32.gmra.mrb[4].mxu1 %vm3434_vm0, %v2891_v38 }
 0x1a5   : > { %992 = vmatprep.mubr.f32.mxu1 %v2682_v5 }
 0x1a8   : > { %2246 = vmatmul.mubr.msk.f32.gmra.mrb[6].mxu1 %vm3434_vm0, %v2854_v20  ;;  %vm1171_vm0 = vcmask 254976  }
 0x1a9   : > { %1270 = vmatprep.mubr.f32.mxu1 %v2682_v5 }
 0x21a   : > { %v737_v9 = vpop.xlane.xlu1 %736 }
 0x21b   : > { %v734_v7 = vpop.xlane.xlu0 %733  ;;  %v757_v12 = vrot.slane %v737_v9, %v2966_v8 }
 0x21c   : > { %v753_v13 = vrot.slane %v734_v7, %v2966_v8 }
 0x21e   : > { %v767_v0 = vsel %vm766_vm4, %v757_v12, %v753_v13  ;;  %v1199_v13 = vld [vmem:[%s3426_s8 + $0x28] sm:$0xff] }
 0x223   : > { %v740_v11 = vpop.xlane.xlu0 %739 }
 0x224   : > { %v761_v18 = vrot.slane %v740_v11, %v2966_v8 }
 0x226   : > { %v769_v27 = vsel %vm768_vm5, %v761_v18, %v767_v0  ;;  %v1201_v18 = vld [vmem:[%s3426_s8 + $0x38] sm:$0xff]  ;;  %v1198_v0 = vld [vmem:[%s3426_s8 + $0x20] sm:$0xff] }
 0x227   : > { %v743_v22 = vpop.xlane.xlu0 %742 }
 0x228   : > { %v765_v23 = vrot.slane %v743_v22, %v2966_v8 }
 0x22a   : > { %v771_v28 = vsel %vm770_vm6, %v765_v23, %v769_v27  ;;  %v3053_v23 = vpack.c.bf16 %v1201_v18, %v1199_v13  ;;  %v1200_v27 = vld [vmem:[%s3426_s8 + $0x30] sm:$0xff] }
 0x22b   : > { %v774_v30 = vsel %vm773_vm7, %v771_v28, -inf  ;;  %v3066_v28 = vpack.c.bf16 %v1200_v27, %v1198_v0 }
 0x22c   : > { %775 = vmax.xlane.f32.xlu1 %v774_v30 }
 0x2b9   : > { %v776_v46 = vpop.xlane.xlu1 %775 }
 0x2ba   : > { %v781_v47 = vrot.slane %v776_v46, %v2825_v10  ;;  %v785_v48 = vrot.slane %v776_v46, %v2989_v42  ;;  %v789_v49 = vrot.slane %v776_v46, %v788_v44  ;;  %v793_v52 = vrot.slane %v776_v46, %v792_v45 }
 0x2bc   : > { %v798_v50 = vsub.f32 %v734_v7, %v781_v47  ;;  %v799_v51 = vsub.f32 %v737_v9, %v785_v48  ;;  %v800_v53 = vsub.f32 %v740_v11, %v789_v49  ;;  %v801_v56 = vsub.f32 %v743_v22, %v793_v52  ;;  %v1195_v9 = vld [vmem:[%s3426_s8 + $0x8] sm:$0xff]  ;;  %v1197_v11 = vld [vmem:[%s3426_s8 + $0x18] sm:$0xff]  ;;  %v886_v48 = vld [vmem:[%s3425_s7] sm:$0x3] }
 0x2bd   : > { %v3040_v12 = vpack.c.bf16 %v1197_v11, %v1195_v9  ;;  %v3051_v22 = vpack.c.bf16 %v1196_v25, %v1194_v17  ;;  %v891_v49 = vrot.slane %v886_v48, %v2825_v10 }
 0x2be   : > { %v802_v54 = vmul.f32 1.442695, %v798_v50  ;;  %v804_v55 = vmul.f32 1.442695, %v799_v51  ;;  %v806_v57 = vmul.f32 1.442695, %v800_v53  ;;  %v895_v51 = vrot.slane %v886_v48, %v2989_v42 }
 0x2bf   : > { %v808_v58 = vmul.f32 1.442695, %v801_v56  ;;  %2410 = vmatprep.subr.bf16.mxu1 %v3040_v12  ;;  %2442 = vmatprep.subr.bf16.mxu0 %v3040_v12  ;;  %v976_v50 = vpop.f32.mrb[0].mxu1 }
 0x2c0   : > { %2550 = vpow2.f32 %v802_v54  ;;  %2412 = vmatpush1.bf16.msra.mxu1 %v3051_v22  ;;  %2444 = vmatpush1.bf16.msra.mxu0 %v3051_v22  ;;  %v977_v52 = vadd.f32 %v976_v50, %v891_v49  ;;  %v978_v53 = vpop.f32.mrb[1].mxu1 }
 0x2c1   : > { %2552 = vpow2.f32 %v804_v55  ;;  %2414 = vmatprep.subr.bf16.mxu1 %v3053_v23  ;;  %2446 = vmatprep.subr.bf16.mxu0 %v3053_v23  ;;  %v979_v54 = vadd.f32 %v978_v53, %v895_v51  ;;  %v982_v56 = vpop.f32.mrb[2].mxu1 }
 0x2c2   : > { %2554 = vpow2.f32 %v806_v57  ;;  %v983_v57 = vadd.f32 %v982_v56, %v891_v49 }
 0x2c3   : > { %2556 = vpow2.f32 %v808_v58  ;;  %v3098_v55 = vcombine.high %v977_v52, %v979_v54  ;;  %v984_v58 = vpop.f32.mrb[3].mxu1 }
 0x2c4   : > { %2416 = vmatpush1.bf16.msra.mxu1 %v3066_v28  ;;  %2448 = vmatpush1.bf16.msra.mxu0 %v3066_v28  ;;  %v985_v61 = vadd.f32 %v984_v58, %v895_v51  ;;  %v988_v62 = vpop.f32.mrb[4].mxu1 }
 0x2c5   : > { %2418 = vmatprep.subr.bf16.mxu1 %v3040_v12  ;;  %2458 = vmatprep.subr.bf16.mxu0 %v3040_v12  ;;  %v989_v2 = vadd.f32 %v988_v62, %v891_v49  ;;  %v990_v3 = vpop.f32.mrb[5].mxu1  ;;  %v1131_v58 = vrot.slane %v3098_v55, 1  ;;  %v1173_v62 = vrot.slane %v3098_v55, 3 }
 0x2c6   : > { %v1008_v63 = vcombine.low %v983_v57, %v985_v61  ;;  %v3100_v1 = vcombine.high %v983_v57, %v985_v61  ;;  %v991_v9 = vadd.f32 %v990_v3, %v895_v51  ;;  %v994_v13 = vpop.f32.mrb[6].mxu1  ;;  %v1152_v61 = vrot.slane %v3098_v55, 2 }
 0x2c7   : > { %1271 = vmatmul.mubr.f32.vlgmr.msra.gmra.mrb[8].mxu1 %v2682_v5  ;;  %v995_v18 = vadd.f32 %v994_v13, %v891_v49  ;;  %v996_v0 = vpop.f32.mrb[7].mxu1 }
 0x2c8   : > { %2420 = vmatpush1.bf16.msra.mxu1 %v3051_v22  ;;  %1368 = vmatprep.mubr.f32.mxu1 %v2682_v5  ;;  %v1012_v11 = vrot.slane %v1008_v63, 7  ;;  %v3102_v17 = vcombine.low %v989_v2, %v991_v9  ;;  %v3104_v25 = vcombine.high %v989_v2, %v991_v9  ;;  %v1112_v57 = vrot.slane %v3100_v1, 7 }
 0x2c9   : > { %2422 = vmatprep.subr.bf16.mxu1 %v3053_v23  ;;  %v1071_v9 = vrot.slane %v1008_v63, 1 }
 0x2ca   : > { %v2999_v59 = vpop.eup %2550  ;;  %v1113_v13 = vsel %vm766_vm4, %v1112_v57, %v3098_v55 }
 0x2cb   : > { %v3001_v60 = vpop.eup %2552  ;;  %815 = vperm.xlu0 %2540, %v2999_v59  }
 0x2cc   : > { %818 = vperm.xlu1 %2541, %v3001_v60   ;;  %v3017_v4 = vpop.eup %2554  ;;  %2424 = vmatpush1.bf16.msra.mxu1 %v3066_v28 }
 0x2cd   : > { %v3022_v7 = vpop.eup %2556  ;;  %2426 = vmatprep.subr.bf16.mxu1 %v3040_v12 }
 0x2d0   : > { %821 = vperm.xlu1 %2541, %v3017_v4  }
 0x2d4   : > { %824 = vperm.xlu1 %2541, %v3022_v7  }
 0x34a   : > { %v816_v38 = vpop.permute.xlu0 %815 }
 0x34b   : > { %v819_v20 = vpop.permute.xlu1 %818  ;;  %v829_v32 = vrot.slane %v816_v38, %v2966_v8 }
 0x34c   : > { %v833_v31 = vrot.slane %v819_v20, %v2966_v8  ;;  %v997_v20 = vadd.f32 %v996_v0, %v895_v51  ;;  %v1153_v0 = vrot.slane %v3100_v1, 1 }
 0x34e   : > { %v842_v36 = vsel %vm766_vm4, %v833_v31, %v829_v32  ;;  %v1010_v31 = vcombine.low %v995_v18, %v997_v20  ;;  %v3109_v32 = vcombine.high %v995_v18, %v997_v20  ;;  %v1114_v18 = vsel %vm1014_vm8, %v1112_v57, %v1113_v13 }
 0x34f   : > { %v822_v30 = vpop.permute.xlu1 %821 }
 0x350   : > { %v837_v34 = vrot.slane %v822_v30, %v2966_v8  ;;  %v1016_v30 = vrot.slane %v3102_v17, 6 }
 0x352   : > { %v843_v41 = vsel %vm768_vm5, %v837_v34, %v842_v36 }
 0x353   : > { %v825_v35 = vpop.permute.xlu1 %824 }
 0x354   : > { %v841_v37 = vrot.slane %v825_v35, %v2966_v8  ;;  %v1007_v8 = vcombine.low %v977_v52, %v979_v54  ;;  %v3118_v52 = vld [vmem:[%s3427_s9] ss:$0 sm:$0xff] }
 0x356   : > { %v844_v46 = vsel %vm770_vm6, %v841_v37, %v843_v41  ;;  %v1013_v27 = vsel %vm766_vm4, %v1012_v11, %v1007_v8  ;;  %v1020_v41 = vrot.slane %v1010_v31, 5  ;;  %v1051_v53 = vrot.slane %v1007_v8, 1 }
 0x357   : > { %v846_v47 = vsel %vm773_vm7, %v844_v46, 0.0  ;;  %v1015_v38 = vsel %vm1014_vm8, %v1012_v11, %v1013_v27  ;;  %v1070_v54 = vrot.slane %v1007_v8, 2  ;;  %v1089_v56 = vrot.slane %v1007_v8, 3 }
 0x358   : > { %847 = vadd.xlane.f32.xlu1 %v846_v47  ;;  %v1017_v34 = vsel %vm768_vm5, %v1016_v30, %v1015_v38  ;;  %v1090_v11 = vrot.slane %v1008_v63, 2  ;;  %v1115_v8 = vrot.slane %v3104_v25, 6  ;;  %v1174_v27 = vrot.slane %v3100_v1, 2 }
 0x359   : > { %v1019_v36 = vsel %vm1018_vm9, %v1016_v30, %v1017_v34  ;;  %v1052_v20 = vsel %vm766_vm4, %v1008_v63, %v1051_v53  ;;  %v1054_v38 = vrot.slane %v3102_v17, 7  ;;  %v1072_v30 = vsel %vm766_vm4, %v1071_v9, %v1070_v54 }
 0x35a   : > { %v1021_v46 = vsel %vm770_vm6, %v1020_v41, %v1019_v36  ;;  %v1091_v34 = vsel %vm766_vm4, %v1090_v11, %v1089_v56  ;;  %v1073_v55 = vsel %vm1014_vm8, %v1071_v9, %v1072_v30  ;;  %v1116_v9 = vsel %vm768_vm5, %v1115_v8, %v1114_v18 }
 0x35b   : > { %v1023_v47 = vsel %vm1022_vm10, %v1020_v41, %v1021_v46  ;;  %v1092_v36 = vsel %vm1014_vm8, %v1090_v11, %v1091_v34  ;;  %v1118_v30 = vrot.slane %v3109_v32, 5  ;;  %v1132_v34 = vsel %vm766_vm4, %v3100_v1, %v1131_v58 }
 0x35c   : > { %v1294_v3 = vrot.slane %v1023_v47, 4  ;;  %v1134_v18 = vrot.slane %v3104_v25, 7  ;;  %vm1129_vm7 = vcmask 261124  }
 0x39a   : > { %v1272_v35 = vpop.f32.mrb[8].mxu1 }
 0x39b   : > { %v1274_v37 = vpop.f32.mrb[9].mxu1  ;;  %v1278_v48 = vadd.f32 %v1272_v35, %v1023_v47  ;;  %v1053_v35 = vsel %vm1014_vm8, %v1008_v63, %v1052_v20  ;;  %v1057_v47 = vrot.slane %v1010_v31, 6 }
 0x39c   : > { %v1291_v2 = vadd.f32 %v3118_v52, %v1274_v37  ;;  %v1093_v37 = vrot.slane %v3102_v17, 1  ;;  %v1055_v46 = vsel %vm768_vm5, %v1054_v38, %v1053_v35  ;;  %v1137_v35 = vrot.slane %v3109_v32, 6 }
 0x39d   : > { %v2247_v49 = vmul.f32 -1.442695, %v1278_v48  ;;  %v1074_v48 = vsel %vm768_vm5, %v3102_v17, %v1073_v55  ;;  %v1154_v55 = vsel %vm766_vm4, %v1153_v0, %v1152_v61 }
 0x39e   : > { %v1075_v63 = vsel %vm1018_vm9, %v3102_v17, %v1074_v48  ;;  %v1094_v53 = vsel %vm768_vm5, %v1093_v37, %v1092_v36 }
 0x39f   : > { %2558 = vpow2.f32 %v2247_v49  ;;  %v1076_v49 = vrot.slane %v1010_v31, 7  ;;  %v1095_v57 = vsel %vm1018_vm9, %v1093_v37, %v1094_v53  ;;  %v1175_v37 = vsel %vm766_vm4, %v1174_v27, %v1173_v62 }
 0x3a0   : > { %v1096_v20 = vsel %vm770_vm6, %v1010_v31, %v1095_v57 }
 0x3a1   : > { %v1077_v56 = vsel %vm770_vm6, %v1076_v49, %v1075_v63  ;;  %v3158_v17 = vsel %vm1022_vm10, %v1010_v31, %v1096_v20  ;;  %v1155_v31 = vsel %vm1014_vm8, %v1153_v0, %v1154_v55  ;;  %v1177_v0 = vrot.slane %v3104_v25, 1 }
 0x3a9   : > { %v2559_v50 = vpop.eup %2558 }
 0x3aa   : > { %v1282_v51 = vadd.f32 1.0, %v2559_v50 }
 0x3ac   : > { %2560 = vrcp.f32 %v1282_v51  ;;  %v1056_v51 = vsel %vm1018_vm9, %v1054_v38, %v1055_v46  ;;  %v1117_v38 = vsel %vm1018_vm9, %v1115_v8, %v1116_v9  ;;  %v1158_v8 = vrot.slane %v3109_v32, 7 }
 0x3ad   : > { %v1058_v54 = vsel %vm770_vm6, %v1057_v47, %v1056_v51  ;;  %v1119_v36 = vsel %vm770_vm6, %v1118_v30, %v1117_v38  ;;  %v1176_v46 = vsel %vm1014_vm8, %v1174_v27, %v1175_v37 }
 0x3ae   : > { %v3151_v13 = vsel %vm1022_vm10, %v1057_v47, %v1058_v54  ;;  %v1178_v51 = vsel %vm768_vm5, %v1177_v0, %v1176_v46 }
 0x3af   : > { %v1179_v27 = vsel %vm1018_vm9, %v1177_v0, %v1178_v51 }
 0x3b0   : > { %v1180_v63 = vsel %vm770_vm6, %v3109_v32, %v1179_v27 }
 0x3b6   : > { %v2561_v41 = vpop.eup %2560 }
 0x3b7   : > { %v1292_v50 = vmul.f32 %v2561_v41, %v1291_v2  ;;  %v3154_v2 = vsel %vm1022_vm10, %v1076_v49, %v1077_v56  ;;  %v3174_v41 = vsel %vm1022_vm10, %v1118_v30, %v1119_v36 }
 0x3b9   : > { %v1296_v11 = vadd.f32 %v1294_v3, %v1292_v50  ;;  %v1133_v3 = vsel %vm1014_vm8, %v3100_v1, %v1132_v34  ;;  %v1156_v1 = vsel %vm768_vm5, %v3104_v25, %v1155_v31 }
 0x3ba   : > { %v1135_v58 = vsel %vm768_vm5, %v1134_v18, %v1133_v3  ;;  %v1157_v47 = vsel %vm1018_vm9, %v3104_v25, %v1156_v1  ;;  %v3198_v25 = vsel %vm1022_vm10, %v3109_v32, %v1180_v63 }
 0x3bb   : > { %v1136_v61 = vsel %vm1018_vm9, %v1134_v18, %v1135_v58  ;;  %v1159_v62 = vsel %vm770_vm6, %v1158_v8, %v1157_v47 }
 0x3bc   : > { %v1138_v48 = vsel %vm770_vm6, %v1137_v35, %v1136_v61  ;;  %v3190_v50 = vsel %vm1022_vm10, %v1158_v8, %v1159_v62 }
 0x3bd   : > { %v3187_v49 = vsel %vm1022_vm10, %v1137_v35, %v1138_v48 }
 0x3e5   : > { %v848_v53 = vpop.xlane.xlu1 %847 }
 0x3e6   : > { %v857_v54 = vrot.slane %v848_v53, %v2989_v42  ;;  %v861_v56 = vrot.slane %v848_v53, %v788_v44  ;;  %v853_v57 = vrot.slane %v848_v53, %v2825_v10  ;;  %v865_v9 = vrot.slane %v848_v53, %v792_v45 }
 0x3e8   : > { %2562 = vrcp.f32 %v857_v54 }
 0x3e9   : > { %2564 = vrcp.f32 %v861_v56 }
 0x3ea   : > { %2566 = vrcp.f32 %v853_v57 }
 0x3eb   : > { %2568 = vrcp.f32 %v865_v9 }
 0x3ec   : > { %2570 = vtanh.f32 %v1296_v11 }
 0x3f2   : > { %v2563_v20 = vpop.eup %2562 }
 0x3f3   : > { %v873_v38 = vmul.f32 %v2563_v20, %v3001_v60  ;;  %v2565_v30 = vpop.eup %2564 }
 0x3f4   : > { %v875_v32 = vmul.f32 %v2565_v30, %v3017_v4  ;;  %v2567_v42 = vpop.eup %2566 }
 0x3f5   : > { %1032 = vperm.xlu0 %2540, %v873_v38   ;;  %v871_v44 = vmul.f32 %v2567_v42, %v2999_v59  ;;  %v2569_v34 = vpop.eup %2568 }
 0x3f6   : > { %v877_v10 = vmul.f32 %v2569_v34, %v3022_v7  ;;  %v2571_v57 = vpop.eup %2570 }
 0x3f9   : > { %1036 = vperm.xlu0 %2540, %v875_v32  }
 0x3fd   : > { %1028 = vperm.xlu0 %2540, %v871_v44  }
 0x401   : > { %1040 = vperm.xlu0 %2540, %v877_v10  }
 0x474   : > { %v1033_v3 = vpop.permute.xlu0 %1032 }
 0x475   : > { %v1042_v18 = vrot.slane %v1033_v3, 7 }
 0x478   : > { %v1037_v45 = vpop.permute.xlu0 %1036 }
 0x479   : > { %v1044_v35 = vrot.slane %v1037_v45, 6  ;;  %v1386_v45 = vrot.slane %v3151_v13, 4 }
 0x47b   : > { %v1185_v58 = vsel %vm766_vm4, %v1044_v35, %v1042_v18 }
 0x47c   : > { %v1029_v60 = vpop.permute.xlu0 %1028 }
 0x47d   : > { %1191 = vst.msk [vmem:[#allocation4 + $0x15] sm:$0x80] %vm1190_vm11, %v1029_v60  ;;  %v1043_v59 = vsel %vm766_vm4, %v1042_v18, %v1029_v60  ;;  %v1063_v4 = vsel %vm768_vm5, %v1042_v18, %v1029_v60  ;;  %v1082_v7 = vsel %vm770_vm6, %v1042_v18, %v1029_v60  ;;  %v1101_v55 = vsel %vm1011_vm12, %v1042_v18, %v1029_v60 }
 0x47e   : > { %v1124_v11 = vsel %vm1014_vm8, %v1042_v18, %v1029_v60  ;;  %v1143_v36 = vsel %vm1018_vm9, %v1042_v18, %v1029_v60  ;;  %v1164_v31 = vsel %vm1022_vm10, %v1042_v18, %v1029_v60  ;;  %vm1150_vm11 = vcmask 253952  }
 0x47f   : > { %v1144_v8 = vsel %vm1022_vm10, %v1044_v35, %v1143_v36  ;;  %1170 = vst.msk [vmem:[#allocation4 + $0x12] sm:$0xc0] %vm1169_vm14, %v1164_v31  ;;  %v1045_v1 = vsel %vm768_vm5, %v1044_v35, %v1043_v59  ;;  %v1064_v61 = vsel %vm770_vm6, %v1044_v35, %v1063_v4  ;;  %v1083_v47 = vsel %vm1011_vm12, %v1044_v35, %v1082_v7 }
 0x480   : > { %v1041_v37 = vpop.permute.xlu0 %1040  ;;  %1149 = vst.msk [vmem:[#allocation4 + $0xf] sm:$0xe0] %vm1148_vm13, %v1144_v8  ;;  %v1102_v0 = vsel %vm1014_vm8, %v1044_v35, %v1101_v55  ;;  %v1125_v48 = vsel %vm1018_vm9, %v1044_v35, %v1124_v11  ;;  %vm3442_vm13 = vcmask 260099   ;;  %vm2009_vm14 = vcmask 523264  }
 0x481   : > { %v1046_v46 = vrot.slane %v1041_v37, 5 }
 0x483   : > { %v1047_v62 = vsel %vm770_vm6, %v1046_v46, %v1045_v1  ;;  %v1065_v51 = vsel %vm1011_vm12, %v1046_v46, %v1064_v61  ;;  %v1084_v27 = vsel %vm1014_vm8, %v1046_v46, %v1083_v47  ;;  %v1103_v63 = vsel %vm1018_vm9, %v1046_v46, %v1102_v0  ;;  %1151 = vst.msk [vmem:[#allocation4 + $0x17] sm:$0x1] %vm1150_vm11, %v1046_v46 }
 0x484   : > { %1050 = vst.msk [vmem:[#allocation4] sm:$0xf] %vm1049_vm15, %v1047_v62  ;;  %v1126_v53 = vsel %vm1022_vm10, %v1046_v46, %v1125_v48  ;;  %v1165_v54 = vsel %vm766_vm4, %v1046_v46, %v1044_v35  ;;  %v1186_v56 = vsel %vm768_vm5, %v1046_v46, %v1185_v58  ;;  %vm3443_vm6 = vcmask 261120  }
 0x485   : > { %1069 = vst.msk [vmem:[#allocation4 + $0x3] sm:$0x1e] %vm1068_vm1, %v1065_v51  ;;  %v1479_v46 = vrot.slane %v3154_v2, 4  ;;  %vm2685_vm12 = vmmov 0   ;;  %vm2030_vm15 = vcmask 785408  }
 0x486   : > { %1088 = vst.msk [vmem:[#allocation4 + $0x6] sm:$0x3c] %vm1087_vm2, %v1084_v27 }
 0x487   : > { %1107 = vst.msk [vmem:[#allocation4 + $0x9] sm:$0x78] %vm3442_vm13, %v1103_v63 }
 0x488   : > { %1130 = vst.msk [vmem:[#allocation4 + $0xc] sm:$0xf0] %vm1129_vm7, %v1126_v53 }
 0x489   : > { %1172 = vst.msk [vmem:[#allocation4 + $0x1a] sm:$0x3] %vm1171_vm0, %v1165_v54  ;;  %vm3444_vm0 = vmmov %vm3443_vm6 }
 0x48a   : > { %1193 = vst.msk [vmem:[#allocation4 + $0x1d] sm:$0x7] %vm1192_vm3, %v1186_v56  ;;  %vm3445_vm4 = vmmov %vm3444_vm0 }
 0x48b   : > { %v1298_v9 = vld [vmem:[#allocation4] sm:$0xf]  ;;  %vm3446_vm5 = vmmov %vm3444_vm0 }
 0x48c   : > { %v1299_v20 = vmul.f32 %v2571_v57, %v1298_v9  ;;  %v1390_v4 = vld [vmem:[#allocation4 + $0x4] sm:$0xf]  ;;  %vm3447_vm8 = vmmov %vm3444_vm0 }
 0x48d   : > { %v1483_v62 = vld [vmem:[#allocation4 + $0x8] sm:$0xf]  ;;  %vm3448_vm9 = vmmov %vm3444_vm0 }
 0x48e   : > { %2249 = vmatmul.mubr.msk.f32.vlgmr.msra.gmra.mrb[10].mxu1 %vm3443_vm6, %v1299_v20  ;;  %vm3449_vm10 = vmmov %vm3444_vm0 }
 0x48f   : > { %2428 = vmatpush1.bf16.msra.mxu1 %v3051_v22  ;;  %1461 = vmatprep.mubr.f32.mxu1 %v2682_v5  ;;  %vm3450_vm1 = vmmov %vm3444_vm0 }
 0x490   : > { %2430 = vmatprep.subr.bf16.mxu1 %v3053_v23 }
 0x493   : > { %2432 = vmatpush1.bf16.msra.mxu1 %v3066_v28 }
 0x494   : > { %2434 = vmatprep.subr.bf16.mxu1 %v3040_v12 }
 0x561   : > { %v1370_v38 = vpop.f32.mrb[10].mxu1 }
 0x562   : > { %v1376_v30 = vadd.f32 %v1370_v38, %v3151_v13  ;;  %v1372_v32 = vpop.f32.mrb[11].mxu1  ;;  %v1572_v38 = vrot.slane %v3158_v17, 4 }
 0x563   : > { %v1383_v10 = vadd.f32 %v3118_v52, %v1372_v32 }
 0x564   : > { %v2250_v42 = vmul.f32 -1.442695, %v1376_v30 }
 0x566   : > { %2572 = vpow2.f32 %v2250_v42 }
 0x570   : > { %v2573_v44 = vpop.eup %2572 }
 0x571   : > { %v1380_v34 = vadd.f32 1.0, %v2573_v44 }
 0x573   : > { %2574 = vrcp.f32 %v1380_v34 }
 0x57d   : > { %v2575_v3 = vpop.eup %2574 }
 0x57e   : > { %v1384_v18 = vmul.f32 %v2575_v3, %v1383_v10 }
 0x580   : > { %v1388_v60 = vadd.f32 %v1386_v45, %v1384_v18 }
 0x582   : > { %2576 = vtanh.f32 %v1388_v60 }
 0x58c   : > { %v2577_v35 = vpop.eup %2576 }
 0x58d   : > { %v1391_v59 = vsub.f32 %v2577_v35, %v1299_v20 }
 0x58f   : > { %v1392_v7 = vmul.f32 %v1391_v59, %v1390_v4 }
 0x591   : > { %v1393_v55 = vadd.f32 %v1392_v7, %v1299_v20  ;;  %v1665_v7 = vrot.slane %v3174_v41, 4 }
 0x593   : > { %2251 = vmatmul.mubr.msk.f32.vlgmr.msra.gmra.mrb[12].mxu1 %vm3444_vm0, %v1393_v55 }
 0x594   : > { %2436 = vmatpush1.bf16.msra.mxu1 %v3051_v22  ;;  %1554 = vmatprep.mubr.f32.mxu1 %v2682_v5 }
 0x595   : > { %2438 = vmatprep.subr.bf16.mxu1 %v3053_v23 }
 0x598   : > { %2440 = vmatpush1.bf16.msra.mxu1 %v3066_v28 }
 0x599   : > { %2450 = vmatprep.subr.bf16.mxu1 %v3040_v12 }
 0x666   : > { %v1463_v13 = vpop.f32.mrb[12].mxu1 }
 0x667   : > { %v1469_v11 = vadd.f32 %v1463_v13, %v3154_v2  ;;  %v1465_v36 = vpop.f32.mrb[13].mxu1 }
 0x668   : > { %v1476_v58 = vadd.f32 %v3118_v52, %v1465_v36 }
 0x669   : > { %v2252_v31 = vmul.f32 -1.442695, %v1469_v11 }
 0x66b   : > { %2578 = vpow2.f32 %v2252_v31  ;;  %v1669_v31 = vld [vmem:[#allocation4 + $0x10] sm:$0xf] }
 0x675   : > { %v2579_v8 = vpop.eup %2578 }
 0x676   : > { %v1473_v37 = vadd.f32 1.0, %v2579_v8 }
 0x678   : > { %2580 = vrcp.f32 %v1473_v37 }
 0x682   : > { %v2581_v1 = vpop.eup %2580 }
 0x683   : > { %v1477_v61 = vmul.f32 %v2581_v1, %v1476_v58 }
 0x685   : > { %v1481_v47 = vadd.f32 %v1479_v46, %v1477_v61 }
 0x687   : > { %2582 = vtanh.f32 %v1481_v47 }
 0x691   : > { %v2583_v0 = vpop.eup %2582 }
 0x692   : > { %v1484_v48 = vsub.f32 %v2583_v0, %v1393_v55 }
 0x694   : > { %v1485_v51 = vmul.f32 %v1484_v48, %v1483_v62 }
 0x696   : > { %v1486_v27 = vadd.f32 %v1485_v51, %v1393_v55 }
 0x698   : > { %2253 = vmatmul.mubr.msk.f32.vlgmr.msra.gmra.mrb[14].mxu1 %vm3445_vm4, %v1486_v27 }
 0x699   : > { %2452 = vmatpush1.bf16.msra.mxu1 %v3051_v22  ;;  %1740 = vmatprep.mubr.f32.mxu1 %v2682_v5 }
 0x69a   : > { %2454 = vmatprep.subr.bf16.mxu1 %v3053_v23 }
 0x69d   : > { %2456 = vmatpush1.bf16.msra.mxu1 %v3066_v28 }
 0x69e   : > { %2466 = vmatprep.subr.bf16.mxu1 %v3040_v12  ;;  %v1576_v12 = vld [vmem:[#allocation4 + $0xc] sm:$0xf] }
 0x76b   : > { %v1556_v2 = vpop.f32.mrb[14].mxu1 }
 0x76c   : > { %v1562_v63 = vadd.f32 %v1556_v2, %v3158_v17  ;;  %v1558_v53 = vpop.f32.mrb[15].mxu1 }
 0x76d   : > { %v1569_v9 = vadd.f32 %v3118_v52, %v1558_v53 }
 0x76e   : > { %v2254_v54 = vmul.f32 -1.442695, %v1562_v63 }
 0x770   : > { %2584 = vpow2.f32 %v2254_v54 }
 0x77a   : > { %v2585_v56 = vpop.eup %2584 }
 0x77b   : > { %v1566_v57 = vadd.f32 1.0, %v2585_v56 }
 0x77d   : > { %2586 = vrcp.f32 %v1566_v57 }
 0x787   : > { %v2587_v20 = vpop.eup %2586 }
 0x788   : > { %v1570_v30 = vmul.f32 %v2587_v20, %v1569_v9 }
 0x78a   : > { %v1574_v32 = vadd.f32 %v1572_v38, %v1570_v30  ;;  %v1851_v30 = vrot.slane %v3190_v50, 4 }
 0x78c   : > { %2588 = vtanh.f32 %v1574_v32 }
 0x796   : > { %v2589_v42 = vpop.eup %2588 }
 0x797   : > { %v1577_v44 = vsub.f32 %v2589_v42, %v1486_v27 }
 0x799   : > { %v1578_v34 = vmul.f32 %v1577_v44, %v1576_v12 }
 0x79b   : > { %v1579_v10 = vadd.f32 %v1578_v34, %v1486_v27  ;;  %v1855_v34 = vld [vmem:[#allocation4 + $0x18] sm:$0xf] }
 0x79d   : > { %2255 = vmatmul.mubr.msk.f32.vlgmr.msra.gmra.mrb[4].mxu0 %vm3446_vm5, %v1579_v10 }
 0x79e   : > { %2460 = vmatpush1.bf16.msra.mxu0 %v3051_v22  ;;  %1833 = vmatprep.mubr.f32.mxu0 %v2682_v5 }
 0x79f   : > { %2462 = vmatprep.subr.bf16.mxu0 %v3053_v23 }
 0x7a2   : > { %2464 = vmatpush1.bf16.msra.mxu0 %v3066_v28 }
 0x870   : > { %v1649_v3 = vpop.f32.mrb[4].mxu0 }
 0x871   : > { %v1655_v17 = vadd.f32 %v1649_v3, %v3174_v41  ;;  %v1651_v45 = vpop.f32.mrb[5].mxu0 }
 0x872   : > { %v1662_v59 = vadd.f32 %v3118_v52, %v1651_v45 }
 0x873   : > { %v2256_v18 = vmul.f32 -1.442695, %v1655_v17  ;;  %v2683_v17 = vmov 1966171168  }
 0x874   : > { %v1955_v45 = vunpack.c.l.s4 %v2683_v17 }
 0x875   : > { %2590 = vpow2.f32 %v2256_v18 }
 0x876   : > { %v1956_v18 = vunpack.c.0.s8 %v1955_v45 }
 0x87f   : > { %v2591_v60 = vpop.eup %2590 }
 0x880   : > { %v1659_v35 = vadd.f32 1.0, %v2591_v60  ;;  %v3293_v60 = vsub.s32 %v1956_v18, %v2816_v6 }
 0x882   : > { %2592 = vrcp.f32 %v1659_v35  ;;  %v1967_v35 = vrot.slane %v1953_v24, %v3293_v60  ;;  %v1996_v6 = vrot.slane %v1982_v43, %v3293_v60  ;;  %v2684_v24 = vmov 0.0|0.0  }
 0x883   : > { %2473 = vmatprep.subr.bf16.mxu0 %v2684_v24 }
 0x88c   : > { %v2593_v4 = vpop.eup %2592 }
 0x88d   : > { %v1663_v55 = vmul.f32 %v2593_v4, %v1662_v59  ;;  %v1989_v59 = vrot.slane %v1981_v39, %v3293_v60  ;;  %v2015_v39 = vld [vmem:[%s3428_s10 + $0x20] sm:$0xff] }
 0x88e   : > { %v2480_v43 = vpack.c.bf16 %v2016_v40, %v2015_v39 }
 0x88f   : > { %v1667_v13 = vadd.f32 %v1665_v7, %v1663_v55  ;;  %v1997_v4 = vcombine.low %v1989_v59, %v1996_v6  ;;  %v2017_v7 = vld [vmem:[%s3428_s10 + $0x30] sm:$0xff]  ;;  %v2018_v55 = vld [vmem:[%s3428_s10 + $0x38] sm:$0xff] }
 0x891   : > { %2594 = vtanh.f32 %v1667_v13  ;;  %v2004_v21 = vrot.slane %v1997_v4, %v3293_v60  ;;  %v2483_v13 = vpack.c.bf16 %v2018_v55, %v2017_v7 }
 0x893   : > { %2005 = vrot.lane.b32.xlu1 %v2004_v21, %s2679_s18  ;;  %s2270_s18 = sshll.u32 %s2775_s25, 6  ;;  %s3377_s25 = scalar_lea.sflag [#allocation6], %s433_s27 }
 0x894   : > { %s3370_s28 = scalar_lea.hbm %s3430_s12, %s2270_s18 }
 0x89b   : > { %v2595_v11 = vpop.eup %2594 }
 0x89c   : > { %v1670_v36 = vsub.f32 %v2595_v11, %v1579_v10  ;;  %v2019_v11 = vld [vmem:[%s3428_s10 + $0x40] sm:$0xff] }
 0x89e   : > { %v1671_v8 = vmul.f32 %v1670_v36, %v1669_v31  ;;  %v2020_v36 = vld [vmem:[%s3428_s10 + $0x48] sm:$0xff] }
 0x89f   : > { %v2486_v31 = vpack.c.bf16 %v2020_v36, %v2019_v11 }
 0x8a0   : > { %v1672_v37 = vadd.f32 %v1671_v8, %v1579_v10  ;;  %v2021_v8 = vld [vmem:[%s3428_s10 + $0x50] sm:$0xff] }
 0x8a2   : > { %2257 = vmatmul.mubr.msk.f32.vlgmr.msra.gmra.mrb[16].mxu1 %vm3447_vm8, %v1672_v37 }
 0x8a3   : > { %2468 = vmatpush1.bf16.msra.mxu1 %v3051_v22  ;;  %1926 = vmatprep.mubr.f32.mxu1 %v2682_v5  ;;  %v1758_v22 = vrot.slane %v3187_v49, 4 }
 0x8a4   : > { %2470 = vmatprep.subr.bf16.mxu1 %v3053_v23 }
 0x8a7   : > { %2472 = vmatpush1.bf16.msra.mxu1 %v3066_v28  ;;  %v1762_v28 = vld [vmem:[#allocation4 + $0x14] sm:$0xf] }
 0x975   : > { %v1742_v58 = vpop.f32.mrb[16].mxu1 }
 0x976   : > { %v1748_v41 = vadd.f32 %v1742_v58, %v3187_v49  ;;  %v1744_v1 = vpop.f32.mrb[17].mxu1 }
 0x977   : > { %v1755_v0 = vadd.f32 %v3118_v52, %v1744_v1 }
 0x978   : > { %v2258_v46 = vmul.f32 -1.442695, %v1748_v41 }
 0x97a   : > { %2596 = vpow2.f32 %v2258_v46 }
 0x984   : > { %v2597_v61 = vpop.eup %2596 }
 0x985   : > { %v1752_v47 = vadd.f32 1.0, %v2597_v61 }
 0x987   : > { %2598 = vrcp.f32 %v1752_v47 }
 0x991   : > { %v2599_v48 = vpop.eup %2598 }
 0x992   : > { %v1756_v62 = vmul.f32 %v2599_v48, %v1755_v0 }
 0x994   : > { %v1760_v51 = vadd.f32 %v1758_v22, %v1756_v62  ;;  %v1944_v62 = vrot.slane %v3198_v25, 4 }
 0x996   : > { %2600 = vtanh.f32 %v1760_v51 }
 0x9a0   : > { %v2601_v23 = vpop.eup %2600 }
 0x9a1   : > { %v1763_v27 = vsub.f32 %v2601_v23, %v1672_v37 }
 0x9a3   : > { %v1764_v2 = vmul.f32 %v1763_v27, %v1762_v28 }
 0x9a5   : > { %v1765_v63 = vadd.f32 %v1764_v2, %v1672_v37  ;;  %v2022_v37 = vld [vmem:[%s3428_s10 + $0x58] sm:$0xff] }
 0x9a6   : > { %v2489_v58 = vpack.c.bf16 %v2022_v37, %v2021_v8  ;;  %v1948_v2 = vld [vmem:[#allocation4 + $0x1c] sm:$0xf] }
 0x9a7   : > { %2259 = vmatmul.mubr.msk.f32.vlgmr.msra.gmra.mrb[6].mxu0 %vm3448_vm9, %v1765_v63 }
 0x9a8   : > { %2475 = vmatpush3.bf16.msra.mxu0 %v2474_v26  ;;  %2366 = vmatprep.mubr.msk.f32.mxu0 %vm2685_vm12, %v2682_v5 }
 0x9a9   : > { %2476 = vmatprep.subr.bf16.mxu0 %v2684_v24 }
 0x9ac   : > { %2478 = vmatpush3.bf16.msra.mxu0 %v2477_v33 }
 0x9ad   : > { %2479 = vmatprep.subr.bf16.mxu0 %v2684_v24 }
 0x9b0   : > { %2481 = vmatpush3.bf16.msra.mxu0 %v2480_v43 }
 0x9b1   : > { %2482 = vmatprep.subr.bf16.mxu0 %v2684_v24 }
 0x9b4   : > { %2484 = vmatpush3.bf16.msra.mxu0 %v2483_v13 }
 0x9b5   : > { %2485 = vmatprep.subr.bf16.mxu0 %v2684_v24 }
 0x9b8   : > { %2487 = vmatpush3.bf16.msra.mxu0 %v2486_v31 }
 0x9b9   : > { %2488 = vmatprep.subr.bf16.mxu0 %v2684_v24 }
 0x9bc   : > { %2490 = vmatpush3.bf16.msra.mxu0 %v2489_v58 }
 0xa7a   : > { %v1835_v53 = vpop.f32.mrb[6].mxu0 }
 0xa7b   : > { %v1841_v54 = vadd.f32 %v1835_v53, %v3190_v50  ;;  %v1837_v56 = vpop.f32.mrb[7].mxu0  ;;  %v1960_v50 = vrot.slane %v1952_v19, %v3293_v60 }
 0xa7c   : > { %v1848_v49 = vadd.f32 %v3118_v52, %v1837_v56 }
 0xa7d   : > { %v2260_v57 = vmul.f32 -1.442695, %v1841_v54  ;;  %v1968_v19 = vcombine.low %v1960_v50, %v1967_v35 }
 0xa7f   : > { %2602 = vpow2.f32 %v2260_v57  ;;  %v2263_v57 = vld [vmem:[%s3429_s11] ss:$0 sm:$0xff] }
 0xa89   : > { %v2603_v9 = vpop.eup %2602 }
 0xa8a   : > { %v1845_v20 = vadd.f32 1.0, %v2603_v9 }
 0xa8c   : > { %2604 = vrcp.f32 %v1845_v20 }
 0xa96   : > { %v2605_v38 = vpop.eup %2604 }
 0xa97   : > { %v1849_v32 = vmul.f32 %v2605_v38, %v1848_v49 }
 0xa99   : > { %v1853_v42 = vadd.f32 %v1851_v30, %v1849_v32 }
 0xa9b   : > { %2606 = vtanh.f32 %v1853_v42 }
 0xaa5   : > { %v2607_v44 = vpop.eup %2606 }
 0xaa6   : > { %v1856_v12 = vsub.f32 %v2607_v44, %v1765_v63 }
 0xaa8   : > { %v1857_v10 = vmul.f32 %v1856_v12, %v1855_v34 }
 0xaaa   : > { %v3288_v3 = vadd.f32 %v1857_v10, %v1765_v63 }
 0xaac   : > { %2261 = vmatmul.mubr.msk.f32.vlgmr.msra.gmra.mrb[18].mxu1 %vm3449_vm10, %v3288_v3 }
 0xb7f   : > { %v1928_v41 = vpop.f32.mrb[18].mxu1 }
 0xb80   : > { %v1934_v1 = vadd.f32 %v1928_v41, %v3198_v25  ;;  %v1930_v46 = vpop.f32.mrb[19].mxu1  ;;  %v2006_v25 = vpop.permute.xlu1 %2005 }
 0xb81   : > { %v1941_v48 = vadd.f32 %v3118_v52, %v1930_v46  ;;  %v1975_v52 = vrot.slane %v1968_v19, %v3293_v60 }
 0xb82   : > { %v2262_v61 = vmul.f32 -1.442695, %v1934_v1 }
 0xb84   : > { %2608 = vpow2.f32 %v2262_v61 }
 0xb8e   : > { %v2609_v47 = vpop.eup %2608 }
 0xb8f   : > { %v1938_v0 = vadd.f32 1.0, %v2609_v47 }
 0xb91   : > { %2610 = vrcp.f32 %v1938_v0 }
 0xb9b   : > { %v2611_v22 = vpop.eup %2610 }
 0xb9c   : > { %v1942_v51 = vmul.f32 %v2611_v22, %v1941_v48 }
 0xb9e   : > { %v1946_v23 = vadd.f32 %v1944_v62, %v1942_v51 }
 0xba0   : > { %2612 = vtanh.f32 %v1946_v23 }
 0xbaa   : > { %v2613_v27 = vpop.eup %2612 }
 0xbab   : > { %v1949_v28 = vsub.f32 %v2613_v27, %v3288_v3 }
 0xbad   : > { %v1950_v63 = vmul.f32 %v1949_v28, %v1948_v2 }
 0xbaf   : > { %v1951_v53 = vadd.f32 %v1950_v63, %v3288_v3 }
 0xbb1   : > { %1978 = vrot.lane.b32.xlu0 %v1951_v53, %s2678_s15  ;;  %s2236_s15 = sshll.u32 %s433_s27, 2 }
 0xbb2   : > { %s435_s16 = scalar_lea.vmem [#allocation5], %s2236_s15 }
 0xbb3   : > { %s2152_s17 = sshll.u32 %s435_s16, 4  ;;  %s3372_s17 = int_to_ptr.vmem [resolvable:$true] %s2152_s17 }
 0xbb4   : > { %s2614_s23 = scalar_lea.vmem %s3372_s17, 64  ;;  %p2621_p0 = scmp.lt.s32.totalorder %s3372_s17, %s2619_s20 }
 0xbb5   : > { %p2615_p11 = scmp.ne.s32.totalorder %s3372_s17, %s2614_s23  ;;  %p2622_p1 = scmp.lt.s32.totalorder %s2620_s29, %s2614_s23 }
 0xbb7   : > { %p2616_p12 = pnand %p2615_p11, %p2792_p5  ;;  %p2623_p2 = por %p2622_p1, %p2621_p0 }
 0xbb9   : > { %p2617_p13 = pneg %p2616_p12 }
 0xbbb   : > { %p2624_p3 = pnand %p2623_p2, %p2617_p13 }
 0xc23   : > { %v1979_v54 = vpop.permute.xlu0 %1978 }
 0xc24   : > { %v2008_v56 = vsel %vm3450_vm1, %v1975_v52, %v1979_v54 }
 0xc25   : > { %v2010_v5 = vsel %vm2009_vm14, %v2008_v56, %v2006_v25 }
 0xc26   : > { %2367 = vmatmul.mubr.msk.f32.vlgmr.msra.gmra.mrb[8].mxu0 %vm2030_vm15, %v2010_v5 }
 0xcf9   : > { %v2100_v9 = vpop.f32.mrb[8].mxu0 }
 0xcfa   : > { %v2101_v20 = vadd.f32 %v2263_v57, %v2100_v9  ;;  %v2368_v49 = vpop.f32.mrb[9].mxu0 }
 0xcfc   : > { %v2104_v38 = vmax.f32 %v2101_v20, 0.0 }
 0xcfe   : > { %v2112_v30 = vrot.slane %v2104_v38, %v3293_v60 }
 0xd00   : > { %v2113_v32 = vcombine.high %v2112_v30, %v2112_v30  ;;  %v2120_v42 = vrot.slane %v2112_v30, %v3293_v60 }
 0xd02   : > { %v2127_v44 = vrot.slane %v2113_v32, %v3293_v60  ;;  %v2128_v12 = vcombine.high %v2120_v42, %v2120_v42  ;;  %2134 = vst.msk [vmem:[%s435_s16] sm:$0x1] %vm1150_vm11, %v2120_v42 }
 0xd04   : > { %v2129_v34 = vcombine.high %v2127_v44, %v2127_v44  ;;  %2135 = vst.msk [vmem:[%s435_s16 + $0x1] sm:$0x1] %vm1150_vm11, %v2127_v44  ;;  %2136 = vst.msk [vmem:[%s435_s16 + $0x2] sm:$0x1] %vm1150_vm11, %v2128_v12 }
 0xd06   : > { %2137 = vst.msk [vmem:[%s435_s16 + $0x3] sm:$0x1] %vm1150_vm11, %v2129_v34 }
 0xd07   : > { %2627 = shalt.err (!%p2624_p3)
}
 0xd08   : > { %s2628_s2 = scalar_lea.hbm %s3370_s28, 64  ;;  %s2632_s18 = scalar_lea.hbm %s3430_s12, 128 }
 0xd09   : > { %p2629_p4 = scmp.ne.s32.totalorder %s3370_s28, %s2628_s2  ;;  %p2633_p9 = scmp.lt.u32.totalorder %s3370_s28, %s3430_s12 }
 0xd0a   : > { %p2634_p10 = scmp.lt.u32.totalorder %s2632_s18, %s2628_s2  ;;  %p2636_p12 = scmp.lt.u32.totalorder %s2628_s2, %s3370_s28 }
 0xd0b   : > { %p2630_p7 = pnand %p2629_p4, %p2792_p5 }
 0xd0c   : > { %p2635_p11 = por %p2634_p10, %p2633_p9 }
 0xd0d   : > { %p2631_p8 = pneg %p2630_p7 }
 0xd0e   : > { %p2637_p13 = por %p2636_p12, %p2635_p11 }
 0xd10   : > { %p2638_p0 = pnand %p2637_p13, %p2631_p8 }
 0xd12   : > { %2641 = shalt.err (!%p2638_p0)
}
 0xd13   : > { %s2687_s26 = smov 16   ;;  %s2688_s23 = smov 1  }
 0xd14   : > { %2491 = dma.vmem_to_hbm [thread:$0]  (%p2792_p5), %s3372_s17, 64, %s3370_s28, %s3377_s25, %s2687_s26, %s2687_s26, %s2688_s23  }
 0xd15 PF: > { %p2497_p1 = scmp.ge.s32.totalorder %s2676_s24, 2  ;;  %s2167_s30 = sand.u32 1, %s2664_s21  }
 0xd16   : > { %s2168_s20 = scalar_lea.sflag [#allocation6], %s2167_s30 }
 0xd17   : > { %p2494_p2 = pnand %p2497_p1, %p2796_p6 }
 0xd19   : > { %2659 = dma.done.wait (!%p2494_p2), %s2168_s20, 64  }
 0xd1a   : > { %2661 = vsyncadd (!%p2494_p2), %s2168_s20, 4294967232  ;;  %s3451_s24 = sld [smem:[#allocation9_spill]]  ;;  %s3452_s29 = sld [smem:[#allocation8_spill]] }
 0xd1b   : > { %s3453_s23 = sld [smem:[#allocation10_spill]]  ;;  %s3454_s21 = smov %s2668_s22 }
 0xd20   : > { %p22_p3 = scmp.ge.s32.totalorder %s3451_s24, 4   ;;  %s3455_s22 = smov %s3452_s29 }
 0xd22   :  { %24 = sbr.rel (!%p22_p3) target bundleno = 5 (0x5), region = 123 }
 0xd29   :  { %2173 = vsyncpa [#allocation6], 1 }
 0xd2a   :  { %2175 = vsyncpa [#allocation6 + $0x1], 1 }

</bundles_post_ra>
